<compile_context>
chip_gen: v5e
topology: v5e:2x2
jax: 0.10.0
libtpu: 0.0.40
codegen_flags: <defaults>
</compile_context>

<pallas_src>
import jax
import jax.numpy as jnp
from jax import lax
from jax.experimental import pallas as pl
from jax.experimental.pallas import tpu as pltpu

_MIB = 1024 * 1024


def _default_num_splits():
    """>1 only on chips with >1 TensorCore (v7x); v5e/v6e are single-TC."""
    try:
        kind = jax.devices()[0].device_kind.lower()
    except Exception:
        return 1
    return 2 if "v7" in kind else 1


def _choose_tiling(n_rows, d, itemsize, *, num_splits, max_tile_bytes,
                   small_queue_bytes):
    """Pick (num_splits, tile_rows, k_tiles_per_split) for the queue axis."""
    assert n_rows % 128 == 0, "queue length must be a multiple of 128"
    total_bytes = n_rows * d * itemsize
    # Small queue: one grid step, whole queue resident, no streaming.
    if total_bytes <= small_queue_bytes:
        return 1, n_rows, 1
    n_chunks = n_rows // 128
    splits = num_splits if (num_splits > 1 and n_chunks % num_splits == 0) else 1
    rows_per_split = n_rows // splits
    row_bytes = d * itemsize
    # Largest 128-aligned tile <= max_tile_bytes that evenly divides the split.
    tile = min(rows_per_split, max(128, (max_tile_bytes // row_bytes) // 128 * 128))
    while rows_per_split % tile != 0:
        tile -= 128
    return splits, tile, rows_per_split // tile


def moco_loss_pallas(query, key, queue, temperature, *,
                     max_tile_bytes=2 * _MIB,
                     small_queue_bytes=4 * _MIB,
                     num_splits=None):
    """query/key: [B, D] (f32). queue: [N, D] (f32 or bf16). Returns scalar loss."""
    B, D = query.shape
    N, D2 = queue.shape
    assert D == D2
    if num_splits is None:
        num_splits = _default_num_splits()
    itemsize = jnp.dtype(queue.dtype).itemsize
    splits, tile_rows, k_tiles = _choose_tiling(
        N, D, itemsize, num_splits=num_splits,
        max_tile_bytes=max_tile_bytes, small_queue_bytes=small_queue_bytes)
    inv_t = 1.0 / float(temperature)

    def kernel(q_ref, k_ref, queue_ref, out_ref, qs_sc, m_sc, s_sc, pos_sc):
        kk = pl.program_id(1)
        nk = pl.num_programs(1)

        @pl.when(kk == 0)
        def _():
            # Hoisted query prep (once per split): fold 1/T into q, cache the
            # matmul operand in the queue's storage dtype, compute pos logit.
            qf = q_ref[...].astype(jnp.float32) * inv_t
            qs_sc[...] = qf.astype(qs_sc.dtype)
            pos_sc[...] = jnp.sum(qf * k_ref[...].astype(jnp.float32),
                                  axis=-1, keepdims=True)
            m_sc[...] = jnp.full(m_sc.shape, -jnp.inf, jnp.float32)
            s_sc[...] = jnp.zeros(s_sc.shape, jnp.float32)

        # Negative logits for this queue tile: native-dtype MXU matmul with f32
        # accumulation; contract over D of both operands (q @ tile.T).
        neg = lax.dot_general(
            qs_sc[...], queue_ref[...],
            dimension_numbers=(((1,), (1,)), ((), ())),
            preferred_element_type=jnp.float32,
        )  # [B, tile_rows]

        # Online log-sum-exp over the negatives.
        m_prev = m_sc[...]
        m_new = jnp.maximum(m_prev, jnp.max(neg, axis=-1, keepdims=True))
        s_sc[...] = (jnp.exp(m_prev - m_new) * s_sc[...]
                     + jnp.sum(jnp.exp(neg - m_new), axis=-1, keepdims=True))
        m_sc[...] = m_new

        @pl.when(kk == nk - 1)
        def _():
            # Single packed output block per split: [m, sum_exp, pos].
            out_ref[0, 0] = m_sc[...]
            out_ref[0, 1] = s_sc[...]
            out_ref[0, 2] = pos_sc[...]

    queue_tile_bytes = tile_rows * D * itemsize
    resident_bytes = 2 * 2 * B * D * jnp.dtype(query.dtype).itemsize  # q,k x2 buf
    vmem_limit = max(8 * _MIB, int(2 * queue_tile_bytes + resident_bytes + 4 * _MIB))

    grid_spec = pltpu.PrefetchScalarGridSpec(
        num_scalar_prefetch=0,
        grid=(splits, k_tiles),
        in_specs=[
            pl.BlockSpec((B, D), lambda s, k: (0, 0)),                        # query (resident)
            pl.BlockSpec((B, D), lambda s, k: (0, 0)),                        # key   (resident)
            pl.BlockSpec((tile_rows, D), lambda s, k: (s * k_tiles + k, 0)),  # queue (streamed)
        ],
        out_specs=pl.BlockSpec((1, 3, B, 1), lambda s, k: (s, 0, 0, 0)),
        scratch_shapes=[
            pltpu.VMEM((B, D), queue.dtype),   # cached q * (1/T) in queue dtype
            pltpu.VMEM((B, 1), jnp.float32),   # running max (negs only)
            pltpu.VMEM((B, 1), jnp.float32),   # running sum_exp (negs only)
            pltpu.VMEM((B, 1), jnp.float32),   # positive logit
        ],
    )

    stats = pl.pallas_call(
        kernel,
        out_shape=jax.ShapeDtypeStruct((splits, 3, B, 1), jnp.float32),
        grid_spec=grid_spec,
        compiler_params=pltpu.CompilerParams(
            dimension_semantics=("parallel", "arbitrary"),
            vmem_limit_bytes=vmem_limit,
        ),
    )(query, key, queue)

    # Combine per-split partial stats (tiny: O(splits * B)).
    m_part = stats[:, 0]        # [splits, B, 1]
    s_part = stats[:, 1]        # [splits, B, 1]
    pos = stats[0, 2]           # [B, 1] (same for every split)
    m_glob = jnp.maximum(jnp.max(m_part, axis=0), pos)
    sum_exp = (jnp.sum(jnp.exp(m_part - m_glob) * s_part, axis=0)
               + jnp.exp(pos - m_glob))
    lse = m_glob + jnp.log(sum_exp)
    return jnp.mean(lse - pos)


def moco_loss_ref(query, key, queue, temperature):
    """Pure-JAX reference (same math; queue may be bf16 or f32)."""
    inv_t = 1.0 / float(temperature)
    qs = query.astype(jnp.float32) * inv_t
    pos = jnp.sum(qs * key.astype(jnp.float32), axis=-1, keepdims=True)
    neg = lax.dot_general(
        qs.astype(queue.dtype), queue,
        dimension_numbers=(((1,), (1,)), ((), ())),
        preferred_element_type=jnp.float32,
    )
    logits = jnp.concatenate([pos, neg], axis=-1)
    lse = jax.nn.logsumexp(logits, axis=-1, keepdims=True)
    return jnp.mean(lse - pos)


if __name__ == "__main__":
    # Module config (synthetic, deterministic init — no checkpoint load).
    negs = 4096      # queue length
    proj_dim = 128   # projection dim
    temperature = 0.07
    batch = 8

    key0 = jax.random.PRNGKey(0)
    k_queue, k_q, k_k = jax.random.split(key0, 3)

    # register_buffer('queue', F.normalize(torch.randn(negs, proj_dim), dim=-1))
    queue_f32 = jax.random.normal(k_queue, (negs, proj_dim), dtype=jnp.float32)
    queue_f32 = queue_f32 / jnp.linalg.norm(queue_f32, axis=-1, keepdims=True)
    # Stream the queue in bf16 (halves HBM traffic on the only large stream).
    queue = queue_f32.astype(jnp.bfloat16)

    # MoCo encoder outputs are L2-normalized; do the same for realism.
    query = jax.random.normal(k_q, (batch, proj_dim), dtype=jnp.float32)
    query = query / jnp.linalg.norm(query, axis=-1, keepdims=True)
    key = jax.random.normal(k_k, (batch, proj_dim), dtype=jnp.float32)
    key = key / jnp.linalg.norm(key, axis=-1, keepdims=True)

    ref_matched = moco_loss_ref(query, key, queue, temperature)   # same bf16 queue
    ref_f32 = moco_loss_ref(query, key, queue_f32, temperature)   # PyTorch (f32) semantics

    # 1) Default path: small queue (1 MiB) -> single grid step, queue resident.
    loss = jax.block_until_ready(moco_loss_pallas(query, key, queue, temperature))
    assert jnp.isfinite(loss), "loss is not finite"
    assert jnp.allclose(loss, ref_matched, rtol=1e-4, atol=1e-4), (loss, ref_matched)
    assert jnp.allclose(loss, ref_f32, rtol=3e-2, atol=3e-2), (loss, ref_f32)

    # 2) Force the streaming (multi-tile) path to validate the online LSE.
    loss_stream = jax.block_until_ready(moco_loss_pallas(
        query, key, queue, temperature,
        max_tile_bytes=256 * 1024, small_queue_bytes=0, num_splits=1))
    assert jnp.allclose(loss_stream, ref_matched, rtol=1e-4, atol=1e-4), (
        loss_stream, ref_matched)

    # 3) Force the split (multi-TensorCore-style) path; correct on any chip.
    loss_split = jax.block_until_ready(moco_loss_pallas(
        query, key, queue, temperature,
        max_tile_bytes=256 * 1024, small_queue_bytes=0, num_splits=2))
    assert jnp.allclose(loss_split, ref_matched, rtol=1e-4, atol=1e-4), (
        loss_split, ref_matched)

    # TODO(synk): MoCoLoss.enqueue (queue ring-buffer update) is not part of
    # forward() and is not implemented here.
    print("KERNEL_OK")
</pallas_src>

<mosaic_0001>
module attributes {stable_mosaic.version = 11 : i64} {
  func.func @kernel(%arg0: i32, %arg1: i32, %arg2: memref<8x128xf32, #tpu.memory_space<vmem>>, %arg3: memref<8x128xf32, #tpu.memory_space<vmem>>, %arg4: memref<4096x128xbf16, #tpu.memory_space<vmem>>, %arg5: memref<1x3x8x1xf32, #tpu.memory_space<vmem>>, %arg6: memref<8x128xbf16, #tpu.memory_space<vmem>>, %arg7: memref<8x1xf32, #tpu.memory_space<vmem>>, %arg8: memref<8x1xf32, #tpu.memory_space<vmem>>, %arg9: memref<8x1xf32, #tpu.memory_space<vmem>>) attributes {dimension_semantics = [#tpu.dimension_semantics<parallel>, #tpu.dimension_semantics<arbitrary>], iteration_bounds = array<i64: 1, 1>, scalar_prefetch = 0 : i64, scratch_operands = 4 : i64, tpu.core_type = #tpu.core_type<tc>, window_params = [{pipeline_mode = #tpu.pipeline_mode<synchronous>, transform_indices = @transform_0, window_bounds = array<i64: 8, 128>}, {pipeline_mode = #tpu.pipeline_mode<synchronous>, transform_indices = @transform_1, window_bounds = array<i64: 8, 128>}, {transform_indices = @transform_2, window_bounds = array<i64: 4096, 128>}, {transform_indices = @transform_3, window_bounds = array<i64: 1, 3, 8, 1>}]} {
    %c0_i32 = arith.constant 0 : i32
    %0 = arith.cmpi eq, %arg1, %c0_i32 : i32
    %1 = arith.extui %0 : i1 to i32
    %c0_i32_0 = arith.constant 0 : i32
    %2 = arith.cmpi ne, %1, %c0_i32_0 : i32
    scf.if %2 {
      %c0_16 = arith.constant 0 : index
      %c0_17 = arith.constant 0 : index
      %25 = vector.load %arg2[%c0_16, %c0_17] : memref<8x128xf32, #tpu.memory_space<vmem>>, vector<8x128xf32>
      %cst_18 = arith.constant 14.2857141 : f32
      %26 = vector.broadcast %cst_18 : f32 to vector<8x128xf32>
      %27 = arith.mulf %25, %26 : vector<8x128xf32>
      %28 = arith.truncf %27 : vector<8x128xf32> to vector<8x128xbf16>
      %c0_19 = arith.constant 0 : index
      %c0_20 = arith.constant 0 : index
      %29 = vector.load %arg6[%c0_19, %c0_20] : memref<8x128xbf16, #tpu.memory_space<vmem>>, vector<8x128xbf16>
      tpu.vector_store %arg6[%c0_19, %c0_20], %28 {strides = array<i32>} : memref<8x128xbf16, #tpu.memory_space<vmem>>, vector<8x128xbf16>,
      %c0_21 = arith.constant 0 : index
      %c0_22 = arith.constant 0 : index
      %30 = vector.load %arg3[%c0_21, %c0_22] : memref<8x128xf32, #tpu.memory_space<vmem>>, vector<8x128xf32>
      %31 = arith.mulf %27, %30 : vector<8x128xf32>
      %cst_23 = arith.constant dense<0.000000e+00> : vector<8xf32>
      %32 = vector.multi_reduction <add>, %31, %cst_23 [1] : vector<8x128xf32> to vector<8xf32>
      %33 = vector.shape_cast %32 : vector<8xf32> to vector<8x1xf32>
      %c0_24 = arith.constant 0 : index
      %c0_25 = arith.constant 0 : index
      %34 = vector.load %arg9[%c0_24, %c0_25] : memref<8x1xf32, #tpu.memory_space<vmem>>, vector<8x1xf32>
      tpu.vector_store %arg9[%c0_24, %c0_25], %33 {strides = array<i32>} : memref<8x1xf32, #tpu.memory_space<vmem>>, vector<8x1xf32>,
      %cst_26 = arith.constant 0xFF800000 : f32
      %35 = vector.broadcast %cst_26 : f32 to vector<8x1xf32>
      %c0_27 = arith.constant 0 : index
      %c0_28 = arith.constant 0 : index
      %36 = vector.load %arg7[%c0_27, %c0_28] : memref<8x1xf32, #tpu.memory_space<vmem>>, vector<8x1xf32>
      tpu.vector_store %arg7[%c0_27, %c0_28], %35 {strides = array<i32>} : memref<8x1xf32, #tpu.memory_space<vmem>>, vector<8x1xf32>,
      %cst_29 = arith.constant 0.000000e+00 : f32
      %37 = vector.broadcast %cst_29 : f32 to vector<8x1xf32>
      %c0_30 = arith.constant 0 : index
      %c0_31 = arith.constant 0 : index
      %38 = vector.load %arg8[%c0_30, %c0_31] : memref<8x1xf32, #tpu.memory_space<vmem>>, vector<8x1xf32>
      tpu.vector_store %arg8[%c0_30, %c0_31], %37 {strides = array<i32>} : memref<8x1xf32, #tpu.memory_space<vmem>>, vector<8x1xf32>,
    } else {
    }
    %c0 = arith.constant 0 : index
    %c0_1 = arith.constant 0 : index
    %3 = vector.load %arg6[%c0, %c0_1] : memref<8x128xbf16, #tpu.memory_space<vmem>>, vector<8x128xbf16>
    %c0_2 = arith.constant 0 : index
    %c0_3 = arith.constant 0 : index
    %4 = vector.load %arg4[%c0_2, %c0_3] : memref<4096x128xbf16, #tpu.memory_space<vmem>>, vector<4096x128xbf16>
    %cst = arith.constant dense<0.000000e+00> : vector<8x4096xf32>
    %5 = tpu.matmul %3, %4, %cst {dimension_numbers = #tpu.dot_dimension_numbers<[1], [1], [0], [0], [0, 0, 1, 0], [], []>} : vector<8x128xbf16>, vector<4096x128xbf16>, vector<8x4096xf32> -> vector<8x4096xf32>
    %c0_4 = arith.constant 0 : index
    %c0_5 = arith.constant 0 : index
    %6 = vector.load %arg7[%c0_4, %c0_5] : memref<8x1xf32, #tpu.memory_space<vmem>>, vector<8x1xf32>
    %cst_6 = arith.constant dense<0xFF800000> : vector<8xf32>
    %7 = vector.multi_reduction <maximumf>, %5, %cst_6 [1] : vector<8x4096xf32> to vector<8xf32>
    %8 = vector.shape_cast %7 : vector<8xf32> to vector<8x1xf32>
    %9 = arith.maximumf %6, %8 : vector<8x1xf32>
    %10 = arith.subf %6, %9 : vector<8x1xf32>
    %11 = math.exp %10 : vector<8x1xf32>
    %c0_7 = arith.constant 0 : index
    %c0_8 = arith.constant 0 : index
    %12 = vector.load %arg8[%c0_7, %c0_8] : memref<8x1xf32, #tpu.memory_space<vmem>>, vector<8x1xf32>
    %13 = arith.mulf %11, %12 : vector<8x1xf32>
    %14 = vector.broadcast %9 : vector<8x1xf32> to vector<8x4096xf32>
    %15 = arith.subf %5, %14 : vector<8x4096xf32>
    %16 = math.exp %15 : vector<8x4096xf32>
    %cst_9 = arith.constant dense<0.000000e+00> : vector<8xf32>
    %17 = vector.multi_reduction <add>, %16, %cst_9 [1] : vector<8x4096xf32> to vector<8xf32>
    %18 = vector.shape_cast %17 : vector<8xf32> to vector<8x1xf32>
    %19 = arith.addf %13, %18 : vector<8x1xf32>
    %c0_10 = arith.constant 0 : index
    %c0_11 = arith.constant 0 : index
    %20 = vector.load %arg8[%c0_10, %c0_11] : memref<8x1xf32, #tpu.memory_space<vmem>>, vector<8x1xf32>
    tpu.vector_store %arg8[%c0_10, %c0_11], %19 {strides = array<i32>} : memref<8x1xf32, #tpu.memory_space<vmem>>, vector<8x1xf32>,
    %c0_12 = arith.constant 0 : index
    %c0_13 = arith.constant 0 : index
    %21 = vector.load %arg7[%c0_12, %c0_13] : memref<8x1xf32, #tpu.memory_space<vmem>>, vector<8x1xf32>
    tpu.vector_store %arg7[%c0_12, %c0_13], %9 {strides = array<i32>} : memref<8x1xf32, #tpu.memory_space<vmem>>, vector<8x1xf32>,
    %c0_i32_14 = arith.constant 0 : i32
    %22 = arith.cmpi eq, %arg1, %c0_i32_14 : i32
    %23 = arith.extui %22 : i1 to i32
    %c0_i32_15 = arith.constant 0 : i32
    %24 = arith.cmpi ne, %23, %c0_i32_15 : i32
    scf.if %24 {
      %c0_16 = arith.constant 0 : index
      %c0_17 = arith.constant 0 : index
      %25 = vector.load %arg7[%c0_16, %c0_17] : memref<8x1xf32, #tpu.memory_space<vmem>>, vector<8x1xf32>
      %c0_18 = arith.constant 0 : index
      %c0_19 = arith.constant 0 : index
      %c0_20 = arith.constant 0 : index
      %c0_21 = arith.constant 0 : index
      %26 = vector.load %arg5[%c0_18, %c0_19, %c0_20, %c0_21] : memref<1x3x8x1xf32, #tpu.memory_space<vmem>>, vector<1x1x8x1xf32>
      %27 = vector.shape_cast %26 : vector<1x1x8x1xf32> to vector<8x1xf32>
      %28 = vector.shape_cast %25 : vector<8x1xf32> to vector<1x1x8x1xf32>
      tpu.vector_store %arg5[%c0_18, %c0_19, %c0_20, %c0_21], %28 {strides = array<i32>} : memref<1x3x8x1xf32, #tpu.memory_space<vmem>>, vector<1x1x8x1xf32>,
      %c0_22 = arith.constant 0 : index
      %c0_23 = arith.constant 0 : index
      %29 = vector.load %arg8[%c0_22, %c0_23] : memref<8x1xf32, #tpu.memory_space<vmem>>, vector<8x1xf32>
      %c0_24 = arith.constant 0 : index
      %c1 = arith.constant 1 : index
      %c0_25 = arith.constant 0 : index
      %c0_26 = arith.constant 0 : index
      %30 = vector.load %arg5[%c0_24, %c1, %c0_25, %c0_26] : memref<1x3x8x1xf32, #tpu.memory_space<vmem>>, vector<1x1x8x1xf32>
      %31 = vector.shape_cast %30 : vector<1x1x8x1xf32> to vector<8x1xf32>
      %32 = vector.shape_cast %29 : vector<8x1xf32> to vector<1x1x8x1xf32>
      tpu.vector_store %arg5[%c0_24, %c1, %c0_25, %c0_26], %32 {strides = array<i32>} : memref<1x3x8x1xf32, #tpu.memory_space<vmem>>, vector<1x1x8x1xf32>,
      %c0_27 = arith.constant 0 : index
      %c0_28 = arith.constant 0 : index
      %33 = vector.load %arg9[%c0_27, %c0_28] : memref<8x1xf32, #tpu.memory_space<vmem>>, vector<8x1xf32>
      %c0_29 = arith.constant 0 : index
      %c2 = arith.constant 2 : index
      %c0_30 = arith.constant 0 : index
      %c0_31 = arith.constant 0 : index
      %34 = vector.load %arg5[%c0_29, %c2, %c0_30, %c0_31] : memref<1x3x8x1xf32, #tpu.memory_space<vmem>>, vector<1x1x8x1xf32>
      %35 = vector.shape_cast %34 : vector<1x1x8x1xf32> to vector<8x1xf32>
      %36 = vector.shape_cast %33 : vector<8x1xf32> to vector<1x1x8x1xf32>
      tpu.vector_store %arg5[%c0_29, %c2, %c0_30, %c0_31], %36 {strides = array<i32>} : memref<1x3x8x1xf32, #tpu.memory_space<vmem>>, vector<1x1x8x1xf32>,
    } else {
    }
    return
  }
  func.func @transform_0(%arg0: i32, %arg1: i32) -> (i32, i32) {
    %c0_i32 = arith.constant 0 : i32
    %c0_i32_0 = arith.constant 0 : i32
    %c0_i32_1 = arith.constant 0 : i32
    return %c0_i32, %c0_i32_0 : i32, i32
  }
  func.func @transform_1(%arg0: i32, %arg1: i32) -> (i32, i32) {
    %c0_i32 = arith.constant 0 : i32
    %c0_i32_0 = arith.constant 0 : i32
    %c0_i32_1 = arith.constant 0 : i32
    return %c0_i32, %c0_i32_0 : i32, i32
  }
  func.func @transform_2(%arg0: i32, %arg1: i32) -> (i32, i32) {
    %c1_i32 = arith.constant 1 : i32
    %0 = arith.muli %arg0, %c1_i32 : i32
    %1 = arith.addi %0, %arg1 : i32
    %c0_i32 = arith.constant 0 : i32
    %c0_i32_0 = arith.constant 0 : i32
    return %1, %c0_i32 : i32, i32
  }
  func.func @transform_3(%arg0: i32, %arg1: i32) -> (i32, i32, i32, i32) {
    %c0_i32 = arith.constant 0 : i32
    %c0_i32_0 = arith.constant 0 : i32
    %c0_i32_1 = arith.constant 0 : i32
    %c0_i32_2 = arith.constant 0 : i32
    return %arg0, %c0_i32, %c0_i32_0, %c0_i32_1 : i32, i32, i32, i32
  }
}

</mosaic_0001>

<bundles_post_ra>
// kernel: tpu_custom_call.1
= control target key start
LH: loop header
LB: loop body
LE: loop exit
PB: predicated region body
PF: predicated region fallthrough
CT: control target
= control target key end

     0   :  { %8 = vsyncpa [#allocation7], 0  ;;  %s4439_s0 = inlined_call_operand.hbm [shape: f32[8,128], index: 0, kind: input, shape index: {}]   ;;  %s4440_s1 = inlined_call_operand.hbm [shape: f32[8,128], index: 1, kind: input, shape index: {}]   ;;  %s4441_s2 = inlined_call_operand.hbm [shape: bf16[4096,128], index: 2, kind: input, shape index: {}]   ;;  %s4442_s3 = inlined_call_operand.vmem [shape: f32[1,3,8,1], index: 3, kind: output, shape index: {}]  }
   0x1   :  { %9 = vsyncpa [#allocation9], 0  ;;  %s26_s14 = sshll.u32 %s4440_s1, 4  ;;  %s4172_s15 = smov [#allocation8]   ;;  %s27_s14 = int_to_ptr.hbm [resolvable:$true] %s26_s14 }
   0x2   :  { %s28_s16 = sshll.u32 %s4172_s15, 4  ;;  %s15_s19 = sshll.u32 %s4439_s0, 4  ;;  %s29_s16 = int_to_ptr.vmem [resolvable:$true] %s28_s16  ;;  %s16_s19 = int_to_ptr.hbm [resolvable:$true] %s15_s19 }
   0x3   :  { %31 = dma.hbm_to_vmem [thread:$0]  %s27_s14, 128, %s29_s16, [#allocation9]  }
   0x4   :  { %s4173_s20 = smov [#allocation6]   ;;  %s40_s24 = sshll.u32 %s4441_s2, 4  ;;  %s41_s24 = int_to_ptr.hbm [resolvable:$true] %s40_s24 }
   0x5   :  { %s17_s21 = sshll.u32 %s4173_s20, 4  ;;  %s4174_s1 = smov [#allocation10]   ;;  %s18_s21 = int_to_ptr.vmem [resolvable:$true] %s17_s21 }
   0x6   :  { %20 = dma.hbm_to_vmem [thread:$0]  %s16_s19, 128, %s18_s21, [#allocation7]  }
   0x7   :  { %s42_s25 = sshll.u32 %s4174_s1, 4  ;;  %s4175_s26 = smov 64   ;;  %s43_s25 = int_to_ptr.vmem [resolvable:$true] %s42_s25 }
   0x8   :  { %s4176_s27 = smov 4  }
   0x9   :  { %48 = dma.hbm_to_vmem [thread:$0]  %s41_s24, 32768, %s43_s25, [#allocation9], %s4175_s26, %s4175_s26, %s4176_s27  }
   0xa   :  { %4168 = dma.done.wait [#allocation7], 128  }
   0xb   :  { %4169 = vsyncadd [#allocation7], 4294967168 }
   0xc   :  { %4170 = dma.done.wait [#allocation9], 32896  }
   0xd   :  { %4171 = vsyncadd [#allocation9], 4294934400  ;;  %v3772_v0 = vld [vmem:[#allocation10 + $0x38] sm:$0xff]  ;;  %v3771_v4 = vld [vmem:[#allocation10 + $0x30] sm:$0xff]  ;;  %vm75_vm0 = vcmask 7168  }
   0xe   :  { %v3780_v1 = vld [vmem:[#allocation10 + $0x78] sm:$0xff]  ;;  %2128 = vmatpush.bf16.xpose.msra.mxu0 %v3772_v0  ;;  %v3779_v5 = vld [vmem:[#allocation10 + $0x70] sm:$0xff]  ;;  %v3770_v8 = vld [vmem:[#allocation10 + $0x28] sm:$0xff] }
   0xf   :  { %v3788_v2 = vld [vmem:[#allocation10 + $0xb8] sm:$0xff]  ;;  %2141 = vmatpush.bf16.xpose.msra.mxu1 %v3780_v1  ;;  %v3787_v6 = vld [vmem:[#allocation10 + $0xb0] sm:$0xff]  ;;  %v3778_v9 = vld [vmem:[#allocation10 + $0x68] sm:$0xff] }
  0x10   :  { %v3796_v3 = vld [vmem:[#allocation10 + $0xf8] sm:$0xff]  ;;  %2154 = vmatpush.bf16.xpose.msra.mxu2 %v3788_v2  ;;  %v3795_v7 = vld [vmem:[#allocation10 + $0xf0] sm:$0xff]  ;;  %v3786_v10 = vld [vmem:[#allocation10 + $0xa8] sm:$0xff] }
  0x11   :  { %2167 = vmatpush.bf16.xpose.msra.mxu3 %v3796_v3  ;;  %v3794_v11 = vld [vmem:[#allocation10 + $0xe8] sm:$0xff]  ;;  %v3769_v12 = vld [vmem:[#allocation10 + $0x20] sm:$0xff]  ;;  %v3768_v16 = vld [vmem:[#allocation10 + $0x18] sm:$0xff] }
  0x12   :  { %v3777_v13 = vld [vmem:[#allocation10 + $0x60] sm:$0xff]  ;;  %v3776_v17 = vld [vmem:[#allocation10 + $0x58] sm:$0xff]  ;;  %v3767_v20 = vld [vmem:[#allocation10 + $0x10] sm:$0xff] }
  0x13   :  { %v3785_v14 = vld [vmem:[#allocation10 + $0xa0] sm:$0xff]  ;;  %v3784_v18 = vld [vmem:[#allocation10 + $0x98] sm:$0xff]  ;;  %v3775_v21 = vld [vmem:[#allocation10 + $0x50] sm:$0xff] }
  0x14   :  { %v3793_v15 = vld [vmem:[#allocation10 + $0xe0] sm:$0xff]  ;;  %v3792_v19 = vld [vmem:[#allocation10 + $0xd8] sm:$0xff]  ;;  %v3783_v22 = vld [vmem:[#allocation10 + $0x90] sm:$0xff] }
  0x15   :  { %v3791_v23 = vld [vmem:[#allocation10 + $0xd0] sm:$0xff]  ;;  %v3766_v24 = vld [vmem:[#allocation10 + $0x8] sm:$0xff]  ;;  %v3765_v28 = vld [vmem:[#allocation10] sm:$0xff] }
  0x16   :  { %2129 = vmatpush.bf16.xpose.msra.mxu0 %v3771_v4  ;;  %v3774_v25 = vld [vmem:[#allocation10 + $0x48] sm:$0xff]  ;;  %v3773_v29 = vld [vmem:[#allocation10 + $0x40] sm:$0xff]  ;;  %v3804_v32 = vld [vmem:[#allocation10 + $0x138] sm:$0xff] }
  0x17   :  { %2142 = vmatpush.bf16.xpose.msra.mxu1 %v3779_v5  ;;  %v3782_v26 = vld [vmem:[#allocation10 + $0x88] sm:$0xff]  ;;  %v3781_v30 = vld [vmem:[#allocation10 + $0x80] sm:$0xff]  ;;  %v3812_v33 = vld [vmem:[#allocation10 + $0x178] sm:$0xff] }
  0x18   :  { %2155 = vmatpush.bf16.xpose.msra.mxu2 %v3787_v6  ;;  %v3790_v27 = vld [vmem:[#allocation10 + $0xc8] sm:$0xff]  ;;  %v3789_v31 = vld [vmem:[#allocation10 + $0xc0] sm:$0xff]  ;;  %v3820_v34 = vld [vmem:[#allocation10 + $0x1b8] sm:$0xff] }
  0x19   :  { %2168 = vmatpush.bf16.xpose.msra.mxu3 %v3795_v7  ;;  %v3828_v35 = vld [vmem:[#allocation10 + $0x1f8] sm:$0xff]  ;;  %v67_v36 = vld [vmem:[#allocation6] sm:$0xff]  ;;  %v3802_v43 = vld [vmem:[#allocation10 + $0x128] sm:$0xff] }
  0x1a   :  { %v3803_v37 = vld [vmem:[#allocation10 + $0x130] sm:$0xff]  ;;  %v4209_v39 = vmul.f32 14.285714, %v67_v36  ;;  %v3810_v44 = vld [vmem:[#allocation10 + $0x168] sm:$0xff]  ;;  %v3801_v48 = vld [vmem:[#allocation10 + $0x120] sm:$0xff] }
  0x1b   :  { %v3811_v38 = vld [vmem:[#allocation10 + $0x170] sm:$0xff]  ;;  %v3818_v45 = vld [vmem:[#allocation10 + $0x1a8] sm:$0xff]  ;;  %v3809_v49 = vld [vmem:[#allocation10 + $0x160] sm:$0xff] }
  0x1c   :  { %v3819_v40 = vld [vmem:[#allocation10 + $0x1b0] sm:$0xff]  ;;  %v69_v42 = vpack.c.bf16 %v4209_v39, %v4209_v39  ;;  %v3826_v46 = vld [vmem:[#allocation10 + $0x1e8] sm:$0xff]  ;;  %v3817_v50 = vld [vmem:[#allocation10 + $0x1a0] sm:$0xff] }
  0x1d   :  { %v3827_v41 = vld [vmem:[#allocation10 + $0x1f0] sm:$0xff]  ;;  %v3825_v51 = vld [vmem:[#allocation10 + $0x1e0] sm:$0xff]  ;;  %v3800_v52 = vld [vmem:[#allocation10 + $0x118] sm:$0xff] }
  0x1e   :  { %2130 = vmatpush.bf16.xpose.msra.mxu0 %v3770_v8  ;;  %70 = vst [vmem:[#allocation2] sm:$0xf] %v69_v42  ;;  %v3808_v53 = vld [vmem:[#allocation10 + $0x158] sm:$0xff]  ;;  %v3799_v56 = vld [vmem:[#allocation10 + $0x110] sm:$0xff]  ;;  %v3798_v60 = vld [vmem:[#allocation10 + $0x108] sm:$0xff] }
  0x1f   :  { %2143 = vmatpush.bf16.xpose.msra.mxu1 %v3778_v9  ;;  %v3816_v54 = vld [vmem:[#allocation10 + $0x198] sm:$0xff]  ;;  %v3807_v57 = vld [vmem:[#allocation10 + $0x150] sm:$0xff]  ;;  %v3806_v61 = vld [vmem:[#allocation10 + $0x148] sm:$0xff] }
  0x20   :  { %2156 = vmatpush.bf16.xpose.msra.mxu2 %v3786_v10  ;;  %v3824_v55 = vld [vmem:[#allocation10 + $0x1d8] sm:$0xff]  ;;  %v3815_v58 = vld [vmem:[#allocation10 + $0x190] sm:$0xff]  ;;  %v3814_v62 = vld [vmem:[#allocation10 + $0x188] sm:$0xff] }
  0x21   :  { %2169 = vmatpush.bf16.xpose.msra.mxu3 %v3794_v11  ;;  %v3823_v59 = vld [vmem:[#allocation10 + $0x1d0] sm:$0xff]  ;;  %v3822_v63 = vld [vmem:[#allocation10 + $0x1c8] sm:$0xff]  ;;  %v3797_v0 = vld [vmem:[#allocation10 + $0x100] sm:$0xff] }
  0x22   :  { %v3805_v1 = vld [vmem:[#allocation10 + $0x140] sm:$0xff]  ;;  %v3836_v4 = vld [vmem:[#allocation10 + $0x238] sm:$0xff]  ;;  %v3835_v8 = vld [vmem:[#allocation10 + $0x230] sm:$0xff] }
  0x23   :  { %v3813_v2 = vld [vmem:[#allocation10 + $0x180] sm:$0xff]  ;;  %v3844_v5 = vld [vmem:[#allocation10 + $0x278] sm:$0xff]  ;;  %v3843_v9 = vld [vmem:[#allocation10 + $0x270] sm:$0xff] }
  0x24   :  { %v3821_v3 = vld [vmem:[#allocation10 + $0x1c0] sm:$0xff]  ;;  %v3852_v6 = vld [vmem:[#allocation10 + $0x2b8] sm:$0xff]  ;;  %v3851_v10 = vld [vmem:[#allocation10 + $0x2b0] sm:$0xff] }
  0x25   :  { %v4213_v47 = vld [vmem:[#allocation2] sm:$0xf]  ;;  %v3860_v7 = vld [vmem:[#allocation10 + $0x2f8] sm:$0xff] }
  0x26   :  { %2131 = vmatpush.bf16.xpose.msra.mxu0 %v3769_v12  ;;  %v3859_v11 = vld [vmem:[#allocation10 + $0x2f0] sm:$0xff]  ;;  %v3834_v12 = vld [vmem:[#allocation10 + $0x228] sm:$0xff]  ;;  %v3868_v36 = vld [vmem:[#allocation10 + $0x338] sm:$0xff] }
  0x27   :  { %2144 = vmatpush.bf16.xpose.msra.mxu1 %v3777_v13  ;;  %v3842_v13 = vld [vmem:[#allocation10 + $0x268] sm:$0xff]  ;;  %v3875_v42 = vld [vmem:[#allocation10 + $0x370] sm:$0xff] }
  0x28   :  { %2157 = vmatpush.bf16.xpose.msra.mxu2 %v3785_v14  ;;  %v3850_v14 = vld [vmem:[#allocation10 + $0x2a8] sm:$0xff] }
  0x29   :  { %2170 = vmatpush.bf16.xpose.msra.mxu3 %v3793_v15  ;;  %v3858_v15 = vld [vmem:[#allocation10 + $0x2e8] sm:$0xff] }
  0x2e   :  { %2132 = vmatpush.bf16.xpose.msra.mxu0 %v3768_v16  ;;  %v3833_v16 = vld [vmem:[#allocation10 + $0x220] sm:$0xff] }
  0x2f   :  { %2145 = vmatpush.bf16.xpose.msra.mxu1 %v3776_v17  ;;  %v3841_v17 = vld [vmem:[#allocation10 + $0x260] sm:$0xff] }
  0x30   :  { %2158 = vmatpush.bf16.xpose.msra.mxu2 %v3784_v18  ;;  %v3849_v18 = vld [vmem:[#allocation10 + $0x2a0] sm:$0xff] }
  0x31   :  { %2171 = vmatpush.bf16.xpose.msra.mxu3 %v3792_v19  ;;  %v3857_v19 = vld [vmem:[#allocation10 + $0x2e0] sm:$0xff] }
  0x36   :  { %2133 = vmatpush.bf16.xpose.msra.mxu0 %v3767_v20  ;;  %v3832_v20 = vld [vmem:[#allocation10 + $0x218] sm:$0xff] }
  0x37   :  { %2146 = vmatpush.bf16.xpose.msra.mxu1 %v3775_v21  ;;  %v3840_v21 = vld [vmem:[#allocation10 + $0x258] sm:$0xff] }
  0x38   :  { %2159 = vmatpush.bf16.xpose.msra.mxu2 %v3783_v22  ;;  %v3848_v22 = vld [vmem:[#allocation10 + $0x298] sm:$0xff] }
  0x39   :  { %2172 = vmatpush.bf16.xpose.msra.mxu3 %v3791_v23  ;;  %v3856_v23 = vld [vmem:[#allocation10 + $0x2d8] sm:$0xff] }
  0x3e   :  { %2134 = vmatpush.bf16.xpose.msra.mxu0 %v3766_v24  ;;  %v3831_v24 = vld [vmem:[#allocation10 + $0x210] sm:$0xff] }
  0x3f   :  { %2147 = vmatpush.bf16.xpose.msra.mxu1 %v3774_v25  ;;  %v3839_v25 = vld [vmem:[#allocation10 + $0x250] sm:$0xff] }
  0x40   :  { %2160 = vmatpush.bf16.xpose.msra.mxu2 %v3782_v26  ;;  %v3847_v26 = vld [vmem:[#allocation10 + $0x290] sm:$0xff] }
  0x41   :  { %2173 = vmatpush.bf16.xpose.msra.mxu3 %v3790_v27  ;;  %v3855_v27 = vld [vmem:[#allocation10 + $0x2d0] sm:$0xff] }
  0x46   :  { %2135 = vmatpush.bf16.xpose.msra.mxu0 %v3765_v28  ;;  %v3830_v28 = vld [vmem:[#allocation10 + $0x208] sm:$0xff] }
  0x47   :  { %2148 = vmatpush.bf16.xpose.msra.mxu1 %v3773_v29  ;;  %v3838_v29 = vld [vmem:[#allocation10 + $0x248] sm:$0xff] }
  0x48   :  { %2161 = vmatpush.bf16.xpose.msra.mxu2 %v3781_v30  ;;  %v3846_v30 = vld [vmem:[#allocation10 + $0x288] sm:$0xff] }
  0x49   :  { %2174 = vmatpush.bf16.xpose.msra.mxu3 %v3789_v31  ;;  %v3854_v31 = vld [vmem:[#allocation10 + $0x2c8] sm:$0xff] }
  0x4d   :  { %2136 = vmatmul.bf16.vlgmr.msra.gmra.mxu0 %v4213_v47 }
  0x4e   :  { %2180 = vmatpush.bf16.xpose.msrb.mxu0 %v3804_v32  ;;  %2149 = vmatmul.bf16.vlgmr.msra.gmra.mxu1 %v4213_v47  ;;  %v3829_v32 = vld [vmem:[#allocation10 + $0x200] sm:$0xff] }
  0x4f   :  { %2193 = vmatpush.bf16.xpose.msrb.mxu1 %v3812_v33  ;;  %2162 = vmatmul.bf16.vlgmr.msra.gmra.mxu2 %v4213_v47  ;;  %v3837_v33 = vld [vmem:[#allocation10 + $0x240] sm:$0xff] }
  0x50   :  { %2206 = vmatpush.bf16.xpose.msrb.mxu2 %v3820_v34  ;;  %2175 = vmatmul.bf16.vlgmr.msra.gmra.mxu3 %v4213_v47  ;;  %v3845_v34 = vld [vmem:[#allocation10 + $0x280] sm:$0xff] }
  0x51   :  { %2219 = vmatpush.bf16.xpose.msrb.mxu3 %v3828_v35  ;;  %v3853_v35 = vld [vmem:[#allocation10 + $0x2c0] sm:$0xff] }
  0x56   :  { %2181 = vmatpush.bf16.xpose.msrb.mxu0 %v3803_v37  ;;  %v3876_v37 = vld [vmem:[#allocation10 + $0x378] sm:$0xff] }
  0x57   :  { %2194 = vmatpush.bf16.xpose.msrb.mxu1 %v3811_v38  ;;  %v3884_v38 = vld [vmem:[#allocation10 + $0x3b8] sm:$0xff] }
  0x58   :  { %2207 = vmatpush.bf16.xpose.msrb.mxu2 %v3819_v40  ;;  %v3892_v40 = vld [vmem:[#allocation10 + $0x3f8] sm:$0xff] }
  0x59   :  { %2220 = vmatpush.bf16.xpose.msrb.mxu3 %v3827_v41  ;;  %v3867_v41 = vld [vmem:[#allocation10 + $0x330] sm:$0xff] }
  0x5e   :  { %2182 = vmatpush.bf16.xpose.msrb.mxu0 %v3802_v43  ;;  %v3883_v43 = vld [vmem:[#allocation10 + $0x3b0] sm:$0xff] }
  0x5f   :  { %2195 = vmatpush.bf16.xpose.msrb.mxu1 %v3810_v44  ;;  %v3891_v44 = vld [vmem:[#allocation10 + $0x3f0] sm:$0xff] }
  0x60   :  { %2208 = vmatpush.bf16.xpose.msrb.mxu2 %v3818_v45  ;;  %v3866_v45 = vld [vmem:[#allocation10 + $0x328] sm:$0xff] }
  0x61   :  { %2221 = vmatpush.bf16.xpose.msrb.mxu3 %v3826_v46  ;;  %v3874_v46 = vld [vmem:[#allocation10 + $0x368] sm:$0xff] }
  0x66   :  { %2183 = vmatpush.bf16.xpose.msrb.mxu0 %v3801_v48  ;;  %v3882_v48 = vld [vmem:[#allocation10 + $0x3a8] sm:$0xff] }
  0x67   :  { %2196 = vmatpush.bf16.xpose.msrb.mxu1 %v3809_v49  ;;  %v3890_v49 = vld [vmem:[#allocation10 + $0x3e8] sm:$0xff] }
  0x68   :  { %2209 = vmatpush.bf16.xpose.msrb.mxu2 %v3817_v50  ;;  %v3865_v50 = vld [vmem:[#allocation10 + $0x320] sm:$0xff] }
  0x69   :  { %2222 = vmatpush.bf16.xpose.msrb.mxu3 %v3825_v51  ;;  %v3873_v51 = vld [vmem:[#allocation10 + $0x360] sm:$0xff] }
  0x6e   :  { %2184 = vmatpush.bf16.xpose.msrb.mxu0 %v3800_v52  ;;  %v3881_v52 = vld [vmem:[#allocation10 + $0x3a0] sm:$0xff] }
  0x6f   :  { %2197 = vmatpush.bf16.xpose.msrb.mxu1 %v3808_v53  ;;  %v3889_v53 = vld [vmem:[#allocation10 + $0x3e0] sm:$0xff] }
  0x70   :  { %2210 = vmatpush.bf16.xpose.msrb.mxu2 %v3816_v54 }
  0x71   :  { %2223 = vmatpush.bf16.xpose.msrb.mxu3 %v3824_v55 }
  0x76   :  { %2185 = vmatpush.bf16.xpose.msrb.mxu0 %v3799_v56  ;;  %v3864_v56 = vld [vmem:[#allocation10 + $0x318] sm:$0xff] }
  0x77   :  { %2198 = vmatpush.bf16.xpose.msrb.mxu1 %v3807_v57  ;;  %v3872_v57 = vld [vmem:[#allocation10 + $0x358] sm:$0xff] }
  0x78   :  { %2211 = vmatpush.bf16.xpose.msrb.mxu2 %v3815_v58  ;;  %v3880_v58 = vld [vmem:[#allocation10 + $0x398] sm:$0xff] }
  0x79   :  { %2224 = vmatpush.bf16.xpose.msrb.mxu3 %v3823_v59  ;;  %v3888_v59 = vld [vmem:[#allocation10 + $0x3d8] sm:$0xff] }
  0x7e   :  { %2186 = vmatpush.bf16.xpose.msrb.mxu0 %v3798_v60 }
  0x7f   :  { %2199 = vmatpush.bf16.xpose.msrb.mxu1 %v3806_v61 }
  0x80   :  { %2212 = vmatpush.bf16.xpose.msrb.mxu2 %v3814_v62 }
  0x81   :  { %2225 = vmatpush.bf16.xpose.msrb.mxu3 %v3822_v63 }
  0x86   :  { %2187 = vmatpush.bf16.xpose.msrb.mxu0 %v3797_v0  ;;  %v3863_v0 = vld [vmem:[#allocation10 + $0x310] sm:$0xff] }
  0x87   :  { %2200 = vmatpush.bf16.xpose.msrb.mxu1 %v3805_v1  ;;  %v3871_v1 = vld [vmem:[#allocation10 + $0x350] sm:$0xff] }
  0x88   :  { %2213 = vmatpush.bf16.xpose.msrb.mxu2 %v3813_v2  ;;  %v3879_v2 = vld [vmem:[#allocation10 + $0x390] sm:$0xff] }
  0x89   :  { %2226 = vmatpush.bf16.xpose.msrb.mxu3 %v3821_v3  ;;  %v3887_v3 = vld [vmem:[#allocation10 + $0x3d0] sm:$0xff] }
  0x8d   :  { %2188 = vmatmul.bf16.vlgmr.msrb.gmra.mxu0 %v4213_v47 }
  0x8e   :  { %2232 = vmatpush.bf16.xpose.msra.mxu0 %v3836_v4  ;;  %2201 = vmatmul.bf16.vlgmr.msrb.gmra.mxu1 %v4213_v47 }
  0x8f   :  { %2245 = vmatpush.bf16.xpose.msra.mxu1 %v3844_v5  ;;  %2214 = vmatmul.bf16.vlgmr.msrb.gmra.mxu2 %v4213_v47 }
  0x90   :  { %2258 = vmatpush.bf16.xpose.msra.mxu2 %v3852_v6  ;;  %2227 = vmatmul.bf16.vlgmr.msrb.gmra.mxu3 %v4213_v47  ;;  %v3862_v6 = vld [vmem:[#allocation10 + $0x308] sm:$0xff] }
  0x91   :  { %2271 = vmatpush.bf16.xpose.msra.mxu3 %v3860_v7  ;;  %v3870_v7 = vld [vmem:[#allocation10 + $0x348] sm:$0xff] }
  0x96   :  { %2233 = vmatpush.bf16.xpose.msra.mxu0 %v3835_v8  ;;  %v3878_v8 = vld [vmem:[#allocation10 + $0x388] sm:$0xff] }
  0x97   :  { %2246 = vmatpush.bf16.xpose.msra.mxu1 %v3843_v9  ;;  %v3886_v9 = vld [vmem:[#allocation10 + $0x3c8] sm:$0xff] }
  0x98   :  { %2259 = vmatpush.bf16.xpose.msra.mxu2 %v3851_v10  ;;  %v3861_v10 = vld [vmem:[#allocation10 + $0x300] sm:$0xff] }
  0x99   :  { %2272 = vmatpush.bf16.xpose.msra.mxu3 %v3859_v11  ;;  %v3869_v11 = vld [vmem:[#allocation10 + $0x340] sm:$0xff] }
  0x9e   :  { %2234 = vmatpush.bf16.xpose.msra.mxu0 %v3834_v12  ;;  %v3877_v12 = vld [vmem:[#allocation10 + $0x380] sm:$0xff] }
  0x9f   :  { %2247 = vmatpush.bf16.xpose.msra.mxu1 %v3842_v13  ;;  %v3885_v13 = vld [vmem:[#allocation10 + $0x3c0] sm:$0xff] }
  0xa0   :  { %2260 = vmatpush.bf16.xpose.msra.mxu2 %v3850_v14  ;;  %v3900_v14 = vld [vmem:[#allocation10 + $0x438] sm:$0xff] }
  0xa1   :  { %2273 = vmatpush.bf16.xpose.msra.mxu3 %v3858_v15  ;;  %v3908_v15 = vld [vmem:[#allocation10 + $0x478] sm:$0xff] }
  0xa6   :  { %2235 = vmatpush.bf16.xpose.msra.mxu0 %v3833_v16  ;;  %v3916_v16 = vld [vmem:[#allocation10 + $0x4b8] sm:$0xff] }
  0xa7   :  { %2248 = vmatpush.bf16.xpose.msra.mxu1 %v3841_v17  ;;  %v3924_v17 = vld [vmem:[#allocation10 + $0x4f8] sm:$0xff] }
  0xa8   :  { %2261 = vmatpush.bf16.xpose.msra.mxu2 %v3849_v18  ;;  %v3899_v18 = vld [vmem:[#allocation10 + $0x430] sm:$0xff] }
  0xa9   :  { %2274 = vmatpush.bf16.xpose.msra.mxu3 %v3857_v19  ;;  %v3907_v19 = vld [vmem:[#allocation10 + $0x470] sm:$0xff] }
  0xae   :  { %2236 = vmatpush.bf16.xpose.msra.mxu0 %v3832_v20  ;;  %v3915_v20 = vld [vmem:[#allocation10 + $0x4b0] sm:$0xff] }
  0xaf   :  { %2249 = vmatpush.bf16.xpose.msra.mxu1 %v3840_v21  ;;  %v3923_v21 = vld [vmem:[#allocation10 + $0x4f0] sm:$0xff] }
  0xb0   :  { %2262 = vmatpush.bf16.xpose.msra.mxu2 %v3848_v22  ;;  %v3898_v22 = vld [vmem:[#allocation10 + $0x428] sm:$0xff] }
  0xb1   :  { %2275 = vmatpush.bf16.xpose.msra.mxu3 %v3856_v23  ;;  %v3906_v23 = vld [vmem:[#allocation10 + $0x468] sm:$0xff] }
  0xb6   :  { %2237 = vmatpush.bf16.xpose.msra.mxu0 %v3831_v24  ;;  %v3914_v24 = vld [vmem:[#allocation10 + $0x4a8] sm:$0xff] }
  0xb7   :  { %2250 = vmatpush.bf16.xpose.msra.mxu1 %v3839_v25  ;;  %v3922_v25 = vld [vmem:[#allocation10 + $0x4e8] sm:$0xff] }
  0xb8   :  { %2263 = vmatpush.bf16.xpose.msra.mxu2 %v3847_v26 }
  0xb9   :  { %2276 = vmatpush.bf16.xpose.msra.mxu3 %v3855_v27 }
  0xbe   :  { %2238 = vmatpush.bf16.xpose.msra.mxu0 %v3830_v28  ;;  %v3897_v28 = vld [vmem:[#allocation10 + $0x420] sm:$0xff] }
  0xbf   :  { %2251 = vmatpush.bf16.xpose.msra.mxu1 %v3838_v29  ;;  %v3905_v29 = vld [vmem:[#allocation10 + $0x460] sm:$0xff] }
  0xc0   :  { %2264 = vmatpush.bf16.xpose.msra.mxu2 %v3846_v30 }
  0xc1   :  { %2277 = vmatpush.bf16.xpose.msra.mxu3 %v3854_v31 }
  0xc6   :  { %2239 = vmatpush.bf16.xpose.msra.mxu0 %v3829_v32  ;;  %v3913_v32 = vld [vmem:[#allocation10 + $0x4a0] sm:$0xff] }
  0xc7   :  { %2252 = vmatpush.bf16.xpose.msra.mxu1 %v3837_v33  ;;  %v3921_v33 = vld [vmem:[#allocation10 + $0x4e0] sm:$0xff] }
  0xc8   :  { %2265 = vmatpush.bf16.xpose.msra.mxu2 %v3845_v34 }
  0xc9   :  { %2278 = vmatpush.bf16.xpose.msra.mxu3 %v3853_v35 }
  0xca   :  { %v4227_v54 = vpop.f32.mrf.mxu0 }
  0xcb   :  { %v4229_v55 = vpop.f32.mrf.mxu1 }
  0xcd   :  { %2240 = vmatmul.bf16.vlgmr.msra.gmra.mxu0 %v4213_v47 }
  0xce   :  { %2284 = vmatpush.bf16.xpose.msrb.mxu0 %v3868_v36  ;;  %2253 = vmatmul.bf16.vlgmr.msra.gmra.mxu1 %v4213_v47  ;;  %v3896_v36 = vld [vmem:[#allocation10 + $0x418] sm:$0xff] }
  0xcf   :  { %2297 = vmatpush.bf16.xpose.msrb.mxu1 %v3876_v37  ;;  %2266 = vmatmul.bf16.vlgmr.msra.gmra.mxu2 %v4213_v47  ;;  %v3904_v37 = vld [vmem:[#allocation10 + $0x458] sm:$0xff] }
  0xd0   :  { %2310 = vmatpush.bf16.xpose.msrb.mxu2 %v3884_v38  ;;  %2279 = vmatmul.bf16.vlgmr.msra.gmra.mxu3 %v4213_v47  ;;  %v3912_v38 = vld [vmem:[#allocation10 + $0x498] sm:$0xff] }
  0xd1   :  { %2323 = vmatpush.bf16.xpose.msrb.mxu3 %v3892_v40  ;;  %v3920_v40 = vld [vmem:[#allocation10 + $0x4d8] sm:$0xff] }
  0xd2   :  { %v4231_v60 = vpop.f32.mrf.mxu2  ;;  %v2139_v62 = vpop.f32.mrf.mxu0 }
  0xd3   :  { %v4233_v61 = vpop.f32.mrf.mxu3  ;;  %v2152_v63 = vpop.f32.mrf.mxu1  ;;  %v3948_v62 = vld [vmem:[#allocation10 + $0x5b8] sm:$0xff] }
  0xd4   :  { %v3956_v63 = vld [vmem:[#allocation10 + $0x5f8] sm:$0xff] }
  0xd6   :  { %2285 = vmatpush.bf16.xpose.msrb.mxu0 %v3867_v41 }
  0xd7   :  { %2298 = vmatpush.bf16.xpose.msrb.mxu1 %v3875_v42 }
  0xd8   :  { %2311 = vmatpush.bf16.xpose.msrb.mxu2 %v3883_v43  ;;  %v3895_v43 = vld [vmem:[#allocation10 + $0x410] sm:$0xff] }
  0xd9   :  { %2324 = vmatpush.bf16.xpose.msrb.mxu3 %v3891_v44  ;;  %v3903_v44 = vld [vmem:[#allocation10 + $0x450] sm:$0xff] }
  0xda   :  { %v2165_v4 = vpop.f32.mrf.mxu2 }
  0xdb   :  { %v2178_v5 = vpop.f32.mrf.mxu3  ;;  %v3930_v4 = vld [vmem:[#allocation10 + $0x528] sm:$0xff] }
  0xdc   :  { %v3938_v5 = vld [vmem:[#allocation10 + $0x568] sm:$0xff] }
  0xde   :  { %2286 = vmatpush.bf16.xpose.msrb.mxu0 %v3866_v45  ;;  %v3911_v45 = vld [vmem:[#allocation10 + $0x490] sm:$0xff] }
  0xdf   :  { %2299 = vmatpush.bf16.xpose.msrb.mxu1 %v3874_v46  ;;  %v3919_v46 = vld [vmem:[#allocation10 + $0x4d0] sm:$0xff] }
  0xe0   :  { %2312 = vmatpush.bf16.xpose.msrb.mxu2 %v3882_v48  ;;  %v3894_v48 = vld [vmem:[#allocation10 + $0x408] sm:$0xff] }
  0xe1   :  { %2325 = vmatpush.bf16.xpose.msrb.mxu3 %v3890_v49  ;;  %v3902_v49 = vld [vmem:[#allocation10 + $0x448] sm:$0xff] }
  0xe6   :  { %2287 = vmatpush.bf16.xpose.msrb.mxu0 %v3865_v50  ;;  %v3910_v50 = vld [vmem:[#allocation10 + $0x488] sm:$0xff] }
  0xe7   :  { %2300 = vmatpush.bf16.xpose.msrb.mxu1 %v3873_v51  ;;  %v3918_v51 = vld [vmem:[#allocation10 + $0x4c8] sm:$0xff] }
  0xe8   :  { %2313 = vmatpush.bf16.xpose.msrb.mxu2 %v3881_v52  ;;  %v3893_v52 = vld [vmem:[#allocation10 + $0x400] sm:$0xff] }
  0xe9   :  { %2326 = vmatpush.bf16.xpose.msrb.mxu3 %v3889_v53  ;;  %v3901_v53 = vld [vmem:[#allocation10 + $0x440] sm:$0xff] }
  0xee   :  { %2288 = vmatpush.bf16.xpose.msrb.mxu0 %v3864_v56  ;;  %v3909_v56 = vld [vmem:[#allocation10 + $0x480] sm:$0xff] }
  0xef   :  { %2301 = vmatpush.bf16.xpose.msrb.mxu1 %v3872_v57  ;;  %v3917_v57 = vld [vmem:[#allocation10 + $0x4c0] sm:$0xff] }
  0xf0   :  { %2314 = vmatpush.bf16.xpose.msrb.mxu2 %v3880_v58  ;;  %v3932_v58 = vld [vmem:[#allocation10 + $0x538] sm:$0xff] }
  0xf1   :  { %2327 = vmatpush.bf16.xpose.msrb.mxu3 %v3888_v59  ;;  %v3940_v59 = vld [vmem:[#allocation10 + $0x578] sm:$0xff] }
  0xf6   :  { %2289 = vmatpush.bf16.xpose.msrb.mxu0 %v3863_v0  ;;  %v3931_v0 = vld [vmem:[#allocation10 + $0x530] sm:$0xff] }
  0xf7   :  { %2302 = vmatpush.bf16.xpose.msrb.mxu1 %v3871_v1  ;;  %v3939_v1 = vld [vmem:[#allocation10 + $0x570] sm:$0xff] }
  0xf8   :  { %2315 = vmatpush.bf16.xpose.msrb.mxu2 %v3879_v2  ;;  %v3947_v2 = vld [vmem:[#allocation10 + $0x5b0] sm:$0xff] }
  0xf9   :  { %2328 = vmatpush.bf16.xpose.msrb.mxu3 %v3887_v3  ;;  %v3955_v3 = vld [vmem:[#allocation10 + $0x5f0] sm:$0xff] }
  0xfe   :  { %2290 = vmatpush.bf16.xpose.msrb.mxu0 %v3862_v6  ;;  %v3946_v6 = vld [vmem:[#allocation10 + $0x5a8] sm:$0xff] }
  0xff   :  { %2303 = vmatpush.bf16.xpose.msrb.mxu1 %v3870_v7  ;;  %v3954_v7 = vld [vmem:[#allocation10 + $0x5e8] sm:$0xff] }
 0x100   :  { %2316 = vmatpush.bf16.xpose.msrb.mxu2 %v3878_v8 }
 0x101   :  { %2329 = vmatpush.bf16.xpose.msrb.mxu3 %v3886_v9 }
 0x106   :  { %2291 = vmatpush.bf16.xpose.msrb.mxu0 %v3861_v10  ;;  %v3929_v10 = vld [vmem:[#allocation10 + $0x520] sm:$0xff] }
 0x107   :  { %2304 = vmatpush.bf16.xpose.msrb.mxu1 %v3869_v11  ;;  %v3937_v11 = vld [vmem:[#allocation10 + $0x560] sm:$0xff] }
 0x108   :  { %2317 = vmatpush.bf16.xpose.msrb.mxu2 %v3877_v12 }
 0x109   :  { %2330 = vmatpush.bf16.xpose.msrb.mxu3 %v3885_v13 }
 0x10a   :  { %v4239_v26 = vpop.f32.mrf.mxu0 }
 0x10b   :  { %v4241_v27 = vpop.f32.mrf.mxu1 }
 0x10d   :  { %2292 = vmatmul.bf16.vlgmr.msrb.gmra.mxu0 %v4213_v47 }
 0x10e   :  { %2336 = vmatpush.bf16.xpose.msra.mxu0 %v3900_v14  ;;  %2305 = vmatmul.bf16.vlgmr.msrb.gmra.mxu1 %v4213_v47  ;;  %v3945_v14 = vld [vmem:[#allocation10 + $0x5a0] sm:$0xff] }
 0x10f   :  { %2349 = vmatpush.bf16.xpose.msra.mxu1 %v3908_v15  ;;  %2318 = vmatmul.bf16.vlgmr.msrb.gmra.mxu2 %v4213_v47  ;;  %v3953_v15 = vld [vmem:[#allocation10 + $0x5e0] sm:$0xff] }
 0x110   :  { %2362 = vmatpush.bf16.xpose.msra.mxu2 %v3916_v16  ;;  %2331 = vmatmul.bf16.vlgmr.msrb.gmra.mxu3 %v4213_v47 }
 0x111   :  { %2375 = vmatpush.bf16.xpose.msra.mxu3 %v3924_v17 }
 0x112   :  { %v4243_v30 = vpop.f32.mrf.mxu2  ;;  %v2191_v34 = vpop.f32.mrf.mxu0 }
 0x113   :  { %v4245_v31 = vpop.f32.mrf.mxu3  ;;  %v2204_v35 = vpop.f32.mrf.mxu1  ;;  %v3942_v34 = vld [vmem:[#allocation10 + $0x588] sm:$0xff] }
 0x114   :  { %v3950_v35 = vld [vmem:[#allocation10 + $0x5c8] sm:$0xff] }
 0x116   :  { %2337 = vmatpush.bf16.xpose.msra.mxu0 %v3899_v18  ;;  %v3928_v18 = vld [vmem:[#allocation10 + $0x518] sm:$0xff] }
 0x117   :  { %2350 = vmatpush.bf16.xpose.msra.mxu1 %v3907_v19  ;;  %v3936_v19 = vld [vmem:[#allocation10 + $0x558] sm:$0xff] }
 0x118   :  { %2363 = vmatpush.bf16.xpose.msra.mxu2 %v3915_v20  ;;  %v3944_v20 = vld [vmem:[#allocation10 + $0x598] sm:$0xff] }
 0x119   :  { %2376 = vmatpush.bf16.xpose.msra.mxu3 %v3923_v21  ;;  %v3952_v21 = vld [vmem:[#allocation10 + $0x5d8] sm:$0xff] }
 0x11a   :  { %v2217_v41 = vpop.f32.mrf.mxu2 }
 0x11b   :  { %v2230_v42 = vpop.f32.mrf.mxu3  ;;  %v3964_v41 = vld [vmem:[#allocation10 + $0x638] sm:$0xff] }
 0x11c   :  { %v3972_v42 = vld [vmem:[#allocation10 + $0x678] sm:$0xff] }
 0x11e   :  { %2338 = vmatpush.bf16.xpose.msra.mxu0 %v3898_v22 }
 0x11f   :  { %2351 = vmatpush.bf16.xpose.msra.mxu1 %v3906_v23 }
 0x120   :  { %2364 = vmatpush.bf16.xpose.msra.mxu2 %v3914_v24  ;;  %v3927_v24 = vld [vmem:[#allocation10 + $0x510] sm:$0xff] }
 0x121   :  { %2377 = vmatpush.bf16.xpose.msra.mxu3 %v3922_v25  ;;  %v3935_v25 = vld [vmem:[#allocation10 + $0x550] sm:$0xff] }
 0x126   :  { %2339 = vmatpush.bf16.xpose.msra.mxu0 %v3897_v28  ;;  %v3943_v28 = vld [vmem:[#allocation10 + $0x590] sm:$0xff] }
 0x127   :  { %2352 = vmatpush.bf16.xpose.msra.mxu1 %v3905_v29  ;;  %v3951_v29 = vld [vmem:[#allocation10 + $0x5d0] sm:$0xff] }
 0x128   :  { %2365 = vmatpush.bf16.xpose.msra.mxu2 %v3913_v32  ;;  %v3926_v32 = vld [vmem:[#allocation10 + $0x508] sm:$0xff] }
 0x129   :  { %2378 = vmatpush.bf16.xpose.msra.mxu3 %v3921_v33  ;;  %v3934_v33 = vld [vmem:[#allocation10 + $0x548] sm:$0xff] }
 0x12e   :  { %2340 = vmatpush.bf16.xpose.msra.mxu0 %v3896_v36  ;;  %v3925_v36 = vld [vmem:[#allocation10 + $0x500] sm:$0xff] }
 0x12f   :  { %2353 = vmatpush.bf16.xpose.msra.mxu1 %v3904_v37  ;;  %v3933_v37 = vld [vmem:[#allocation10 + $0x540] sm:$0xff] }
 0x130   :  { %2366 = vmatpush.bf16.xpose.msra.mxu2 %v3912_v38  ;;  %v3941_v38 = vld [vmem:[#allocation10 + $0x580] sm:$0xff] }
 0x131   :  { %2379 = vmatpush.bf16.xpose.msra.mxu3 %v3920_v40  ;;  %v3949_v40 = vld [vmem:[#allocation10 + $0x5c0] sm:$0xff] }
 0x136   :  { %2341 = vmatpush.bf16.xpose.msra.mxu0 %v3895_v43  ;;  %v3980_v43 = vld [vmem:[#allocation10 + $0x6b8] sm:$0xff] }
 0x137   :  { %2354 = vmatpush.bf16.xpose.msra.mxu1 %v3903_v44  ;;  %v3988_v44 = vld [vmem:[#allocation10 + $0x6f8] sm:$0xff] }
 0x138   :  { %2367 = vmatpush.bf16.xpose.msra.mxu2 %v3911_v45  ;;  %v3963_v45 = vld [vmem:[#allocation10 + $0x630] sm:$0xff] }
 0x139   :  { %2380 = vmatpush.bf16.xpose.msra.mxu3 %v3919_v46  ;;  %v3971_v46 = vld [vmem:[#allocation10 + $0x670] sm:$0xff] }
 0x13e   :  { %2342 = vmatpush.bf16.xpose.msra.mxu0 %v3894_v48  ;;  %v3979_v48 = vld [vmem:[#allocation10 + $0x6b0] sm:$0xff] }
 0x13f   :  { %2355 = vmatpush.bf16.xpose.msra.mxu1 %v3902_v49  ;;  %v3987_v49 = vld [vmem:[#allocation10 + $0x6f0] sm:$0xff] }
 0x140   :  { %2368 = vmatpush.bf16.xpose.msra.mxu2 %v3910_v50  ;;  %v3962_v50 = vld [vmem:[#allocation10 + $0x628] sm:$0xff] }
 0x141   :  { %2381 = vmatpush.bf16.xpose.msra.mxu3 %v3918_v51  ;;  %v3970_v51 = vld [vmem:[#allocation10 + $0x668] sm:$0xff] }
 0x146   :  { %2343 = vmatpush.bf16.xpose.msra.mxu0 %v3893_v52  ;;  %v3978_v52 = vld [vmem:[#allocation10 + $0x6a8] sm:$0xff] }
 0x147   :  { %2356 = vmatpush.bf16.xpose.msra.mxu1 %v3901_v53  ;;  %v3986_v53 = vld [vmem:[#allocation10 + $0x6e8] sm:$0xff] }
 0x148   :  { %2369 = vmatpush.bf16.xpose.msra.mxu2 %v3909_v56 }
 0x149   :  { %2382 = vmatpush.bf16.xpose.msra.mxu3 %v3917_v57 }
 0x14a   :  { %v4251_v8 = vpop.f32.mrf.mxu0 }
 0x14b   :  { %v4253_v9 = vpop.f32.mrf.mxu1 }
 0x14d   :  { %2344 = vmatmul.bf16.vlgmr.msra.gmra.mxu0 %v4213_v47 }
 0x14e   :  { %2388 = vmatpush.bf16.xpose.msrb.mxu0 %v3932_v58  ;;  %2357 = vmatmul.bf16.vlgmr.msra.gmra.mxu1 %v4213_v47  ;;  %v3961_v58 = vld [vmem:[#allocation10 + $0x620] sm:$0xff] }
 0x14f   :  { %2401 = vmatpush.bf16.xpose.msrb.mxu1 %v3940_v59  ;;  %2370 = vmatmul.bf16.vlgmr.msra.gmra.mxu2 %v4213_v47  ;;  %v3969_v59 = vld [vmem:[#allocation10 + $0x660] sm:$0xff] }
 0x150   :  { %2414 = vmatpush.bf16.xpose.msrb.mxu2 %v3948_v62  ;;  %2383 = vmatmul.bf16.vlgmr.msra.gmra.mxu3 %v4213_v47 }
 0x151   :  { %2427 = vmatpush.bf16.xpose.msrb.mxu3 %v3956_v63 }
 0x152   :  { %v4255_v12 = vpop.f32.mrf.mxu2  ;;  %v2243_v16 = vpop.f32.mrf.mxu0 }
 0x153   :  { %v4257_v13 = vpop.f32.mrf.mxu3  ;;  %v2256_v17 = vpop.f32.mrf.mxu1  ;;  %v3975_v16 = vld [vmem:[#allocation10 + $0x690] sm:$0xff] }
 0x154   :  { %v3983_v17 = vld [vmem:[#allocation10 + $0x6d0] sm:$0xff] }
 0x156   :  { %2389 = vmatpush.bf16.xpose.msrb.mxu0 %v3931_v0  ;;  %v3977_v0 = vld [vmem:[#allocation10 + $0x6a0] sm:$0xff] }
 0x157   :  { %2402 = vmatpush.bf16.xpose.msrb.mxu1 %v3939_v1  ;;  %v3985_v1 = vld [vmem:[#allocation10 + $0x6e0] sm:$0xff] }
 0x158   :  { %2415 = vmatpush.bf16.xpose.msrb.mxu2 %v3947_v2 }
 0x159   :  { %2428 = vmatpush.bf16.xpose.msrb.mxu3 %v3955_v3 }
 0x15a   :  { %v2269_v22 = vpop.f32.mrf.mxu2 }
 0x15b   :  { %v2282_v23 = vpop.f32.mrf.mxu3  ;;  %v3957_v22 = vld [vmem:[#allocation10 + $0x600] sm:$0xff] }
 0x15c   :  { %v3965_v23 = vld [vmem:[#allocation10 + $0x640] sm:$0xff] }
 0x15e   :  { %2390 = vmatpush.bf16.xpose.msrb.mxu0 %v3930_v4  ;;  %v3960_v4 = vld [vmem:[#allocation10 + $0x618] sm:$0xff] }
 0x15f   :  { %2403 = vmatpush.bf16.xpose.msrb.mxu1 %v3938_v5  ;;  %v3968_v5 = vld [vmem:[#allocation10 + $0x658] sm:$0xff] }
 0x160   :  { %2416 = vmatpush.bf16.xpose.msrb.mxu2 %v3946_v6  ;;  %v3976_v6 = vld [vmem:[#allocation10 + $0x698] sm:$0xff] }
 0x161   :  { %2429 = vmatpush.bf16.xpose.msrb.mxu3 %v3954_v7  ;;  %v3984_v7 = vld [vmem:[#allocation10 + $0x6d8] sm:$0xff] }
 0x166   :  { %2391 = vmatpush.bf16.xpose.msrb.mxu0 %v3929_v10 }
 0x167   :  { %2404 = vmatpush.bf16.xpose.msrb.mxu1 %v3937_v11 }
 0x168   :  { %2417 = vmatpush.bf16.xpose.msrb.mxu2 %v3945_v14  ;;  %v3959_v14 = vld [vmem:[#allocation10 + $0x610] sm:$0xff] }
 0x169   :  { %2430 = vmatpush.bf16.xpose.msrb.mxu3 %v3953_v15  ;;  %v3967_v15 = vld [vmem:[#allocation10 + $0x650] sm:$0xff] }
 0x16e   :  { %2392 = vmatpush.bf16.xpose.msrb.mxu0 %v3928_v18  ;;  %v3958_v18 = vld [vmem:[#allocation10 + $0x608] sm:$0xff] }
 0x16f   :  { %2405 = vmatpush.bf16.xpose.msrb.mxu1 %v3936_v19  ;;  %v3966_v19 = vld [vmem:[#allocation10 + $0x648] sm:$0xff] }
 0x170   :  { %2418 = vmatpush.bf16.xpose.msrb.mxu2 %v3944_v20  ;;  %v3974_v20 = vld [vmem:[#allocation10 + $0x688] sm:$0xff] }
 0x171   :  { %2431 = vmatpush.bf16.xpose.msrb.mxu3 %v3952_v21  ;;  %v3982_v21 = vld [vmem:[#allocation10 + $0x6c8] sm:$0xff] }
 0x176   :  { %2393 = vmatpush.bf16.xpose.msrb.mxu0 %v3927_v24  ;;  %v3973_v24 = vld [vmem:[#allocation10 + $0x680] sm:$0xff] }
 0x177   :  { %2406 = vmatpush.bf16.xpose.msrb.mxu1 %v3935_v25  ;;  %v3981_v25 = vld [vmem:[#allocation10 + $0x6c0] sm:$0xff] }
 0x178   :  { %2419 = vmatpush.bf16.xpose.msrb.mxu2 %v3943_v28  ;;  %v3996_v28 = vld [vmem:[#allocation10 + $0x738] sm:$0xff] }
 0x179   :  { %2432 = vmatpush.bf16.xpose.msrb.mxu3 %v3951_v29  ;;  %v4004_v29 = vld [vmem:[#allocation10 + $0x778] sm:$0xff] }
 0x17e   :  { %2394 = vmatpush.bf16.xpose.msrb.mxu0 %v3926_v32  ;;  %v4012_v32 = vld [vmem:[#allocation10 + $0x7b8] sm:$0xff] }
 0x17f   :  { %2407 = vmatpush.bf16.xpose.msrb.mxu1 %v3934_v33  ;;  %v4020_v33 = vld [vmem:[#allocation10 + $0x7f8] sm:$0xff] }
 0x180   :  { %2420 = vmatpush.bf16.xpose.msrb.mxu2 %v3942_v34  ;;  %v3995_v34 = vld [vmem:[#allocation10 + $0x730] sm:$0xff] }
 0x181   :  { %2433 = vmatpush.bf16.xpose.msrb.mxu3 %v3950_v35  ;;  %v4003_v35 = vld [vmem:[#allocation10 + $0x770] sm:$0xff] }
 0x186   :  { %2395 = vmatpush.bf16.xpose.msrb.mxu0 %v3925_v36  ;;  %v4011_v36 = vld [vmem:[#allocation10 + $0x7b0] sm:$0xff] }
 0x187   :  { %2408 = vmatpush.bf16.xpose.msrb.mxu1 %v3933_v37  ;;  %v4019_v37 = vld [vmem:[#allocation10 + $0x7f0] sm:$0xff] }
 0x188   :  { %2421 = vmatpush.bf16.xpose.msrb.mxu2 %v3941_v38  ;;  %v3994_v38 = vld [vmem:[#allocation10 + $0x728] sm:$0xff] }
 0x189   :  { %2434 = vmatpush.bf16.xpose.msrb.mxu3 %v3949_v40  ;;  %v4002_v40 = vld [vmem:[#allocation10 + $0x768] sm:$0xff] }
 0x18a   :  { %v4263_v56 = vpop.f32.mrf.mxu0 }
 0x18b   :  { %v4265_v57 = vpop.f32.mrf.mxu1 }
 0x18d   :  { %2396 = vmatmul.bf16.vlgmr.msrb.gmra.mxu0 %v4213_v47 }
 0x18e   :  { %2440 = vmatpush.bf16.xpose.msra.mxu0 %v3964_v41  ;;  %2409 = vmatmul.bf16.vlgmr.msrb.gmra.mxu1 %v4213_v47  ;;  %v4010_v41 = vld [vmem:[#allocation10 + $0x7a8] sm:$0xff] }
 0x18f   :  { %2453 = vmatpush.bf16.xpose.msra.mxu1 %v3972_v42  ;;  %2422 = vmatmul.bf16.vlgmr.msrb.gmra.mxu2 %v4213_v47  ;;  %v4018_v42 = vld [vmem:[#allocation10 + $0x7e8] sm:$0xff] }
 0x190   :  { %2466 = vmatpush.bf16.xpose.msra.mxu2 %v3980_v43  ;;  %2435 = vmatmul.bf16.vlgmr.msrb.gmra.mxu3 %v4213_v47 }
 0x191   :  { %2479 = vmatpush.bf16.xpose.msra.mxu3 %v3988_v44 }
 0x192   :  { %v4267_v62 = vpop.f32.mrf.mxu2  ;;  %v2295_v2 = vpop.f32.mrf.mxu0 }
 0x193   :  { %v4269_v63 = vpop.f32.mrf.mxu3  ;;  %v2308_v3 = vpop.f32.mrf.mxu1 }
 0x196   :  { %2441 = vmatpush.bf16.xpose.msra.mxu0 %v3963_v45  ;;  %v3993_v45 = vld [vmem:[#allocation10 + $0x720] sm:$0xff] }
 0x197   :  { %2454 = vmatpush.bf16.xpose.msra.mxu1 %v3971_v46  ;;  %v4001_v46 = vld [vmem:[#allocation10 + $0x760] sm:$0xff] }
 0x198   :  { %2467 = vmatpush.bf16.xpose.msra.mxu2 %v3979_v48 }
 0x199   :  { %2480 = vmatpush.bf16.xpose.msra.mxu3 %v3987_v49 }
 0x19a   :  { %v2321_v10 = vpop.f32.mrf.mxu2 }
 0x19b   :  { %v2334_v11 = vpop.f32.mrf.mxu3  ;;  %v3990_v10 = vld [vmem:[#allocation10 + $0x708] sm:$0xff] }
 0x19c   :  { %v3998_v11 = vld [vmem:[#allocation10 + $0x748] sm:$0xff] }
 0x19e   :  { %2442 = vmatpush.bf16.xpose.msra.mxu0 %v3962_v50  ;;  %v4009_v50 = vld [vmem:[#allocation10 + $0x7a0] sm:$0xff] }
 0x19f   :  { %2455 = vmatpush.bf16.xpose.msra.mxu1 %v3970_v51  ;;  %v4017_v51 = vld [vmem:[#allocation10 + $0x7e0] sm:$0xff] }
 0x1a0   :  { %2468 = vmatpush.bf16.xpose.msra.mxu2 %v3978_v52 }
 0x1a1   :  { %2481 = vmatpush.bf16.xpose.msra.mxu3 %v3986_v53 }
 0x1a6   :  { %2443 = vmatpush.bf16.xpose.msra.mxu0 %v3961_v58  ;;  %v3992_v58 = vld [vmem:[#allocation10 + $0x718] sm:$0xff] }
 0x1a7   :  { %2456 = vmatpush.bf16.xpose.msra.mxu1 %v3969_v59  ;;  %v4000_v59 = vld [vmem:[#allocation10 + $0x758] sm:$0xff] }
 0x1a8   :  { %2469 = vmatpush.bf16.xpose.msra.mxu2 %v3977_v0  ;;  %v4008_v0 = vld [vmem:[#allocation10 + $0x798] sm:$0xff] }
 0x1a9   :  { %2482 = vmatpush.bf16.xpose.msra.mxu3 %v3985_v1  ;;  %v4016_v1 = vld [vmem:[#allocation10 + $0x7d8] sm:$0xff] }
 0x1ae   :  { %2444 = vmatpush.bf16.xpose.msra.mxu0 %v3960_v4  ;;  %v3991_v4 = vld [vmem:[#allocation10 + $0x710] sm:$0xff] }
 0x1af   :  { %2457 = vmatpush.bf16.xpose.msra.mxu1 %v3968_v5  ;;  %v3999_v5 = vld [vmem:[#allocation10 + $0x750] sm:$0xff] }
 0x1b0   :  { %2470 = vmatpush.bf16.xpose.msra.mxu2 %v3976_v6  ;;  %v4007_v6 = vld [vmem:[#allocation10 + $0x790] sm:$0xff] }
 0x1b1   :  { %2483 = vmatpush.bf16.xpose.msra.mxu3 %v3984_v7  ;;  %v4015_v7 = vld [vmem:[#allocation10 + $0x7d0] sm:$0xff] }
 0x1b6   :  { %2445 = vmatpush.bf16.xpose.msra.mxu0 %v3959_v14  ;;  %v4006_v14 = vld [vmem:[#allocation10 + $0x788] sm:$0xff] }
 0x1b7   :  { %2458 = vmatpush.bf16.xpose.msra.mxu1 %v3967_v15  ;;  %v4014_v15 = vld [vmem:[#allocation10 + $0x7c8] sm:$0xff] }
 0x1b8   :  { %2471 = vmatpush.bf16.xpose.msra.mxu2 %v3975_v16  ;;  %v3989_v16 = vld [vmem:[#allocation10 + $0x700] sm:$0xff] }
 0x1b9   :  { %2484 = vmatpush.bf16.xpose.msra.mxu3 %v3983_v17  ;;  %v3997_v17 = vld [vmem:[#allocation10 + $0x740] sm:$0xff] }
 0x1be   :  { %2446 = vmatpush.bf16.xpose.msra.mxu0 %v3958_v18  ;;  %v4005_v18 = vld [vmem:[#allocation10 + $0x780] sm:$0xff] }
 0x1bf   :  { %2459 = vmatpush.bf16.xpose.msra.mxu1 %v3966_v19  ;;  %v4013_v19 = vld [vmem:[#allocation10 + $0x7c0] sm:$0xff] }
 0x1c0   :  { %2472 = vmatpush.bf16.xpose.msra.mxu2 %v3974_v20 }
 0x1c1   :  { %2485 = vmatpush.bf16.xpose.msra.mxu3 %v3982_v21 }
 0x1c6   :  { %2447 = vmatpush.bf16.xpose.msra.mxu0 %v3957_v22 }
 0x1c7   :  { %2460 = vmatpush.bf16.xpose.msra.mxu1 %v3965_v23 }
 0x1c8   :  { %2473 = vmatpush.bf16.xpose.msra.mxu2 %v3973_v24 }
 0x1c9   :  { %2486 = vmatpush.bf16.xpose.msra.mxu3 %v3981_v25 }
 0x1ca   :  { %v4275_v43 = vpop.f32.mrf.mxu0 }
 0x1cb   :  { %v4277_v44 = vpop.f32.mrf.mxu1 }
 0x1cd   :  { %2448 = vmatmul.bf16.vlgmr.msra.gmra.mxu0 %v4213_v47 }
 0x1ce   :  { %2492 = vmatpush.bf16.xpose.msrb.mxu0 %v3996_v28  ;;  %2461 = vmatmul.bf16.vlgmr.msra.gmra.mxu1 %v4213_v47 }
 0x1cf   :  { %2505 = vmatpush.bf16.xpose.msrb.mxu1 %v4004_v29  ;;  %2474 = vmatmul.bf16.vlgmr.msra.gmra.mxu2 %v4213_v47 }
 0x1d0   :  { %2518 = vmatpush.bf16.xpose.msrb.mxu2 %v4012_v32  ;;  %2487 = vmatmul.bf16.vlgmr.msra.gmra.mxu3 %v4213_v47  ;;  %v2545_v32 = vmax.f32 %v4227_v54, %v4239_v26 }
 0x1d1   :  { %2531 = vmatpush.bf16.xpose.msrb.mxu3 %v4020_v33  ;;  %v2546_v33 = vmax.f32 %v4229_v55, %v4241_v27 }
 0x1d2   :  { %v4279_v48 = vpop.f32.mrf.mxu2  ;;  %v2347_v52 = vpop.f32.mrf.mxu0 }
 0x1d3   :  { %v4281_v49 = vpop.f32.mrf.mxu3  ;;  %v2360_v53 = vpop.f32.mrf.mxu1 }
 0x1d6   :  { %2493 = vmatpush.bf16.xpose.msrb.mxu0 %v3995_v34  ;;  %v2549_v34 = vmax.f32 %v2545_v32, %v2546_v33 }
 0x1d7   :  { %2506 = vmatpush.bf16.xpose.msrb.mxu1 %v4003_v35 }
 0x1d8   :  { %2519 = vmatpush.bf16.xpose.msrb.mxu2 %v4011_v36  ;;  %v2548_v36 = vmax.f32 %v4233_v61, %v4245_v31 }
 0x1d9   :  { %2532 = vmatpush.bf16.xpose.msrb.mxu3 %v4019_v37 }
 0x1da   :  { %v2373_v2 = vpop.f32.mrf.mxu2 }
 0x1db   :  { %v2386_v3 = vpop.f32.mrf.mxu3 }
 0x1de   :  { %2494 = vmatpush.bf16.xpose.msrb.mxu0 %v3994_v38 }
 0x1df   :  { %2507 = vmatpush.bf16.xpose.msrb.mxu1 %v4002_v40 }
 0x1e0   :  { %2520 = vmatpush.bf16.xpose.msrb.mxu2 %v4010_v41 }
 0x1e1   :  { %2533 = vmatpush.bf16.xpose.msrb.mxu3 %v4018_v42 }
 0x1e6   :  { %2495 = vmatpush.bf16.xpose.msrb.mxu0 %v3993_v45 }
 0x1e7   :  { %2508 = vmatpush.bf16.xpose.msrb.mxu1 %v4001_v46 }
 0x1e8   :  { %2521 = vmatpush.bf16.xpose.msrb.mxu2 %v4009_v50 }
 0x1e9   :  { %2534 = vmatpush.bf16.xpose.msrb.mxu3 %v4017_v51 }
 0x1ee   :  { %2496 = vmatpush.bf16.xpose.msrb.mxu0 %v3992_v58 }
 0x1ef   :  { %2509 = vmatpush.bf16.xpose.msrb.mxu1 %v4000_v59 }
 0x1f0   :  { %2522 = vmatpush.bf16.xpose.msrb.mxu2 %v4008_v0 }
 0x1f1   :  { %2535 = vmatpush.bf16.xpose.msrb.mxu3 %v4016_v1 }
 0x1f6   :  { %2497 = vmatpush.bf16.xpose.msrb.mxu0 %v3991_v4 }
 0x1f7   :  { %2510 = vmatpush.bf16.xpose.msrb.mxu1 %v3999_v5 }
 0x1f8   :  { %2523 = vmatpush.bf16.xpose.msrb.mxu2 %v4007_v6 }
 0x1f9   :  { %2536 = vmatpush.bf16.xpose.msrb.mxu3 %v4015_v7 }
 0x1fe   :  { %2498 = vmatpush.bf16.xpose.msrb.mxu0 %v3990_v10 }
 0x1ff   :  { %2511 = vmatpush.bf16.xpose.msrb.mxu1 %v3998_v11 }
 0x200   :  { %2524 = vmatpush.bf16.xpose.msrb.mxu2 %v4006_v14 }
 0x201   :  { %2537 = vmatpush.bf16.xpose.msrb.mxu3 %v4014_v15  ;;  %v4177_v15 = vmov -inf  }
 0x202   :  { %77 = vst.msk [vmem:[#allocation3] sm:$0xff] %vm75_vm0, %v4177_v15 }
 0x206   :  { %2499 = vmatpush.bf16.xpose.msrb.mxu0 %v3989_v16 }
 0x207   :  { %2512 = vmatpush.bf16.xpose.msrb.mxu1 %v3997_v17 }
 0x208   :  { %2525 = vmatpush.bf16.xpose.msrb.mxu2 %v4005_v18 }
 0x209   :  { %2538 = vmatpush.bf16.xpose.msrb.mxu3 %v4013_v19 }
 0x20a   :  { %v4287_v20 = vpop.f32.mrf.mxu0 }
 0x20b   :  { %v4289_v21 = vpop.f32.mrf.mxu1 }
 0x20d   :  { %2500 = vmatmul.bf16.vlgmr.msrb.gmra.mxu0 %v4213_v47 }
 0x20e   :  { %2513 = vmatmul.bf16.vlgmr.msrb.gmra.mxu1 %v4213_v47 }
 0x20f   :  { %2526 = vmatmul.bf16.vlgmr.msrb.gmra.mxu2 %v4213_v47 }
 0x210   :  { %2539 = vmatmul.bf16.vlgmr.msrb.gmra.mxu3 %v4213_v47  ;;  %v2547_v47 = vmax.f32 %v4231_v60, %v4243_v30 }
 0x212   :  { %v4291_v22 = vpop.f32.mrf.mxu2  ;;  %v2399_v24 = vpop.f32.mrf.mxu0  ;;  %v2550_v35 = vmax.f32 %v2547_v47, %v2549_v34 }
 0x213   :  { %v4293_v23 = vpop.f32.mrf.mxu3  ;;  %v2412_v25 = vpop.f32.mrf.mxu1 }
 0x214   :  { %v2551_v37 = vmax.f32 %v2548_v36, %v2550_v35 }
 0x216   :  { %v2552_v38 = vmax.f32 %v4251_v8, %v2551_v37 }
 0x218   :  { %v2553_v42 = vmax.f32 %v4253_v9, %v2552_v38 }
 0x21a   :  { %v2425_v28 = vpop.f32.mrf.mxu2  ;;  %v2554_v45 = vmax.f32 %v4255_v12, %v2553_v42 }
 0x21b   :  { %v2438_v29 = vpop.f32.mrf.mxu3 }
 0x21c   :  { %v2555_v53 = vmax.f32 %v4257_v13, %v2554_v45  ;;  %v4178_v45 = vmov 0  }
 0x21d   :  { %4029 = vset.pattern.permute.xlu0 %v4178_v45 }
 0x21e   :  { %v2556_v58 = vmax.f32 %v4263_v56, %v2555_v53 }
 0x220   :  { %v2557_v1 = vmax.f32 %v4265_v57, %v2556_v58 }
 0x222   :  { %v2558_v2 = vmax.f32 %v4267_v62, %v2557_v1 }
 0x224   :  { %v2559_v3 = vmax.f32 %v4269_v63, %v2558_v2 }
 0x226   :  { %v2560_v4 = vmax.f32 %v4275_v43, %v2559_v3 }
 0x228   :  { %v2561_v5 = vmax.f32 %v4277_v44, %v2560_v4 }
 0x22a   :  { %v2562_v6 = vmax.f32 %v4279_v48, %v2561_v5 }
 0x22c   :  { %v2563_v7 = vmax.f32 %v4281_v49, %v2562_v6 }
 0x22e   :  { %v2564_v10 = vmax.f32 %v4287_v20, %v2563_v7 }
 0x230   :  { %v2565_v11 = vmax.f32 %v4289_v21, %v2564_v10 }
 0x232   :  { %v2566_v14 = vmax.f32 %v4291_v22, %v2565_v11 }
 0x234   :  { %v2567_v16 = vmax.f32 %v4293_v23, %v2566_v14 }
 0x24a   :  { %v4304_v40 = vpop.f32.mrf.mxu0 }
 0x24b   :  { %v4306_v41 = vpop.f32.mrf.mxu1  ;;  %v2568_v17 = vmax.f32 %v4304_v40, %v2567_v16 }
 0x24d   :  { %v2569_v18 = vmax.f32 %v4306_v41, %v2568_v17 }
 0x252   :  { %v4310_v46 = vpop.f32.mrf.mxu2  ;;  %v2451_v51 = vpop.f32.mrf.mxu0 }
 0x253   :  { %v4312_v50 = vpop.f32.mrf.mxu3  ;;  %v2464_v52 = vpop.f32.mrf.mxu1  ;;  %v2570_v19 = vmax.f32 %v4310_v46, %v2569_v18  ;;  %v4344_v51 = vld [vmem:[#allocation3] sm:$0xff] }
 0x255   :  { %v2571_v24 = vmax.f32 %v4312_v50, %v2570_v19 }
 0x25a   :  { %v2477_v59 = vpop.f32.mrf.mxu2 }
 0x25b   :  { %v2490_v0 = vpop.f32.mrf.mxu3 }
 0x25c   :  { %v4179_v0 = vmov 0.0  }
 0x25d   :  { %78 = vst.msk [vmem:[#allocation4] sm:$0xff] %vm75_vm0, %v4179_v0 }
 0x28a   :  { %v4332_v25 = vpop.f32.mrf.mxu0 }
 0x28b   :  { %v4334_v28 = vpop.f32.mrf.mxu1  ;;  %v2572_v29 = vmax.f32 %v4332_v25, %v2571_v24 }
 0x28d   :  { %v2573_v32 = vmax.f32 %v4334_v28, %v2572_v29 }
 0x292   :  { %v4338_v33 = vpop.f32.mrf.mxu2  ;;  %v2503_v35 = vpop.f32.mrf.mxu0 }
 0x293   :  { %v4340_v47 = vpop.f32.mrf.mxu3  ;;  %v2574_v34 = vmax.f32 %v4338_v33, %v2573_v32  ;;  %v2516_v36 = vpop.f32.mrf.mxu1 }
 0x295   :  { %v2575_v37 = vmax.f32 %v4340_v47, %v2574_v34 }
 0x297   :  { %2576 = vmax.xlane.f32.xlu0 %v2575_v37 }
 0x29a   :  { %v2529_v38 = vpop.f32.mrf.mxu2 }
 0x29b   :  { %v2542_v42 = vpop.f32.mrf.mxu3 }
 0x30a   :  { %v2577_v52 = vpop.xlane.xlu0 %2576 }
 0x30b   :  { %v4347_v53 = vmax.f32 %v4344_v51, %v2577_v52 }
 0x30d   :  { %v2579_v58 = vsub.f32 %v4344_v51, %v4347_v53  ;;  %2721 = vst.msk [vmem:[#allocation3] sm:$0xff] %vm75_vm0, %v4347_v53  ;;  %2586 = vperm.xlu0 %4029, %v4347_v53  }
 0x314   :  { %v2725_v59 = vld [vmem:[#allocation3] sm:$0xff] }
 0x315   :  { %2726 = vst.msk [vmem:[%s4442_s3] sm:$0xff] %vm75_vm0, %v2725_v59 }
 0x37f   :  { %v4359_v1 = vpop.permute.xlu0 %2586 }
 0x380   :  { %v2589_v2 = vsub.f32 %v4227_v54, %v4359_v1  ;;  %v2590_v3 = vsub.f32 %v4229_v55, %v4359_v1  ;;  %v2591_v4 = vsub.f32 %v4231_v60, %v4359_v1  ;;  %v2592_v5 = vsub.f32 %v4233_v61, %v4359_v1 }
 0x381   :  { %v2593_v10 = vsub.f32 %v4239_v26, %v4359_v1  ;;  %v2594_v14 = vsub.f32 %v4241_v27, %v4359_v1  ;;  %v2595_v55 = vsub.f32 %v4243_v30, %v4359_v1  ;;  %v2596_v61 = vsub.f32 %v4245_v31, %v4359_v1 }
 0x382   :  { %v2621_v6 = vmul.f32 1.442695, %v2589_v2  ;;  %v2623_v7 = vmul.f32 1.442695, %v2590_v3  ;;  %v2625_v11 = vmul.f32 1.442695, %v2591_v4  ;;  %v2597_v26 = vsub.f32 %v4251_v8, %v4359_v1 }
 0x383   :  { %v2627_v54 = vmul.f32 1.442695, %v2592_v5  ;;  %v2629_v60 = vmul.f32 1.442695, %v2593_v10  ;;  %v2631_v15 = vmul.f32 1.442695, %v2594_v14  ;;  %v2598_v24 = vsub.f32 %v4253_v9, %v4359_v1 }
 0x384   :  { %4030 = vpow2.f32 %v2621_v6  ;;  %v2633_v18 = vmul.f32 1.442695, %v2595_v55  ;;  %v2635_v30 = vmul.f32 1.442695, %v2596_v61  ;;  %v2599_v31 = vsub.f32 %v4255_v12, %v4359_v1 }
 0x385   :  { %4032 = vpow2.f32 %v2623_v7  ;;  %v2637_v34 = vmul.f32 1.442695, %v2597_v26  ;;  %v2600_v8 = vsub.f32 %v4257_v13, %v4359_v1  ;;  %v2639_v37 = vmul.f32 1.442695, %v2598_v24 }
 0x386   :  { %4034 = vpow2.f32 %v2625_v11  ;;  %v2601_v9 = vsub.f32 %v4263_v56, %v4359_v1  ;;  %v2641_v45 = vmul.f32 1.442695, %v2599_v31  ;;  %v2602_v12 = vsub.f32 %v4265_v57, %v4359_v1 }
 0x387   :  { %4036 = vpow2.f32 %v2627_v54  ;;  %v2643_v0 = vmul.f32 1.442695, %v2600_v8  ;;  %v2603_v13 = vsub.f32 %v4267_v62, %v4359_v1  ;;  %v2604_v56 = vsub.f32 %v4269_v63, %v4359_v1 }
 0x388   :  { %4038 = vpow2.f32 %v2629_v60  ;;  %v2645_v4 = vmul.f32 1.442695, %v2601_v9  ;;  %v2647_v7 = vmul.f32 1.442695, %v2602_v12  ;;  %v2605_v57 = vsub.f32 %v4275_v43, %v4359_v1 }
 0x389   :  { %4040 = vpow2.f32 %v2631_v15  ;;  %v2649_v14 = vmul.f32 1.442695, %v2603_v13  ;;  %v2606_v62 = vsub.f32 %v4277_v44, %v4359_v1  ;;  %v2651_v60 = vmul.f32 1.442695, %v2604_v56 }
 0x38a   :  { %v4031_v16 = vpop.eup %4030  ;;  %4042 = vpow2.f32 %v2633_v18  ;;  %v2607_v63 = vsub.f32 %v4279_v48, %v4359_v1  ;;  %v2608_v43 = vsub.f32 %v4281_v49, %v4359_v1  ;;  %v2609_v44 = vsub.f32 %v4287_v20, %v4359_v1 }
 0x38b   :  { %v4033_v17 = vpop.eup %4032  ;;  %4044 = vpow2.f32 %v2635_v30  ;;  %v2655_v18 = vmul.f32 1.442695, %v2606_v62  ;;  %v2610_v48 = vsub.f32 %v4289_v21, %v4359_v1  ;;  %v2611_v49 = vsub.f32 %v4291_v22, %v4359_v1 }
 0x38c   :  { %v2685_v27 = vadd.f32 %v4033_v17, %v4031_v16  ;;  %v4035_v19 = vpop.eup %4034  ;;  %4046 = vpow2.f32 %v2637_v34  ;;  %v2653_v16 = vmul.f32 1.442695, %v2605_v57  ;;  %v2657_v24 = vmul.f32 1.442695, %v2607_v63 }
 0x38d   :  { %v4037_v32 = vpop.eup %4036  ;;  %4048 = vpow2.f32 %v2639_v37  ;;  %v2612_v20 = vsub.f32 %v4293_v23, %v4359_v1  ;;  %v2663_v37 = vmul.f32 1.442695, %v2610_v48  ;;  %v2613_v21 = vsub.f32 %v4304_v40, %v4359_v1 }
 0x38e   :  { %v2686_v29 = vadd.f32 %v4035_v19, %v2685_v27  ;;  %v4039_v36 = vpop.eup %4038  ;;  %4050 = vpow2.f32 %v2641_v45  ;;  %v2665_v9 = vmul.f32 1.442695, %v2611_v49  ;;  %v2614_v22 = vsub.f32 %v4306_v41, %v4359_v1 }
 0x38f   :  { %v4041_v42 = vpop.eup %4040  ;;  %4052 = vpow2.f32 %v2643_v0  ;;  %v2615_v23 = vsub.f32 %v4310_v46, %v4359_v1  ;;  %v2616_v40 = vsub.f32 %v4312_v50, %v4359_v1  ;;  %v2617_v41 = vsub.f32 %v4332_v25, %v4359_v1 }
 0x390   :  { %v2687_v35 = vadd.f32 %v4037_v32, %v2686_v29  ;;  %v4043_v59 = vpop.eup %4042  ;;  %4054 = vpow2.f32 %v2645_v4  ;;  %v2659_v32 = vmul.f32 1.442695, %v2608_v43  ;;  %v2671_v4 = vmul.f32 1.442695, %v2614_v22 }
 0x391   :  { %v4045_v3 = vpop.eup %4044  ;;  %4056 = vpow2.f32 %v2647_v7  ;;  %v2673_v56 = vmul.f32 1.442695, %v2615_v23  ;;  %v2618_v46 = vsub.f32 %v4334_v28, %v4359_v1  ;;  %v2619_v50 = vsub.f32 %v4338_v33, %v4359_v1 }
 0x392   :  { %v2688_v38 = vadd.f32 %v4039_v36, %v2687_v35  ;;  %v4047_v6 = vpop.eup %4046  ;;  %4058 = vpow2.f32 %v2649_v14  ;;  %v2661_v35 = vmul.f32 1.442695, %v2609_v44  ;;  %v2620_v25 = vsub.f32 %v4340_v47, %v4359_v1 }
 0x393   :  { %v4049_v11 = vpop.eup %4048  ;;  %4060 = vpow2.f32 %v2651_v60  ;;  %v2679_v60 = vmul.f32 1.442695, %v2618_v46  ;;  %v2681_v28 = vmul.f32 1.442695, %v2619_v50 }
 0x394   :  { %v2689_v52 = vadd.f32 %v4041_v42, %v2688_v38  ;;  %v4051_v55 = vpop.eup %4050  ;;  %4062 = vpow2.f32 %v2653_v16 }
 0x395   :  { %v4053_v15 = vpop.eup %4052  ;;  %4064 = vpow2.f32 %v2655_v18 }
 0x396   :  { %v2690_v2 = vadd.f32 %v4043_v59, %v2689_v52  ;;  %v4055_v26 = vpop.eup %4054  ;;  %4066 = vpow2.f32 %v2657_v24  ;;  %v2667_v59 = vmul.f32 1.442695, %v2612_v20 }
 0x397   :  { %v4057_v19 = vpop.eup %4056  ;;  %4068 = vpow2.f32 %v2659_v32  ;;  %v2580_v32 = vmul.f32 1.442695, %v2579_v58 }
 0x398   :  { %v2691_v5 = vadd.f32 %v4045_v3, %v2690_v2  ;;  %v4059_v29 = vpop.eup %4058  ;;  %4070 = vpow2.f32 %v2661_v35  ;;  %v2669_v2 = vmul.f32 1.442695, %v2613_v21 }
 0x399   :  { %v4061_v34 = vpop.eup %4060  ;;  %4072 = vpow2.f32 %v2663_v37 }
 0x39a   :  { %v2692_v10 = vadd.f32 %v4047_v6, %v2691_v5  ;;  %v4063_v8 = vpop.eup %4062  ;;  %4074 = vpow2.f32 %v2665_v9 }
 0x39b   :  { %v4065_v42 = vpop.eup %4064  ;;  %4076 = vpow2.f32 %v2667_v59 }
 0x39c   :  { %v2693_v54 = vadd.f32 %v4049_v11, %v2692_v10  ;;  %v4067_v52 = vpop.eup %4066  ;;  %4078 = vpow2.f32 %v2669_v2  ;;  %v2675_v11 = vmul.f32 1.442695, %v2616_v40 }
 0x39d   :  { %v4069_v0 = vpop.eup %4068  ;;  %4080 = vpow2.f32 %v2671_v4 }
 0x39e   :  { %v2694_v61 = vadd.f32 %v4051_v55, %v2693_v54  ;;  %v4071_v13 = vpop.eup %4070  ;;  %4082 = vpow2.f32 %v2673_v56  ;;  %v2677_v54 = vmul.f32 1.442695, %v2617_v41 }
 0x39f   :  { %v4073_v6 = vpop.eup %4072  ;;  %4084 = vpow2.f32 %v2675_v11 }
 0x3a0   :  { %v2695_v17 = vadd.f32 %v4053_v15, %v2694_v61  ;;  %v4075_v10 = vpop.eup %4074  ;;  %4086 = vpow2.f32 %v2677_v54 }
 0x3a1   :  { %v4077_v14 = vpop.eup %4076  ;;  %4088 = vpow2.f32 %v2679_v60 }
 0x3a2   :  { %v2696_v27 = vadd.f32 %v4055_v26, %v2695_v17  ;;  %v4079_v62 = vpop.eup %4078  ;;  %v2683_v17 = vmul.f32 1.442695, %v2620_v25  ;;  %4090 = vpow2.f32 %v2681_v28 }
 0x3a3   :  { %v4081_v15 = vpop.eup %4080 }
 0x3a4   :  { %v2697_v30 = vadd.f32 %v4057_v19, %v2696_v27  ;;  %v4083_v16 = vpop.eup %4082  ;;  %4092 = vpow2.f32 %v2683_v17 }
 0x3a5   :  { %v4085_v43 = vpop.eup %4084  ;;  %4094 = vpow2.f32 %v2580_v32 }
 0x3a6   :  { %v2698_v31 = vadd.f32 %v4059_v29, %v2697_v30  ;;  %v4087_v18 = vpop.eup %4086  ;;  %v71_v29 = vld [vmem:[#allocation8] sm:$0xff] }
 0x3a7   :  { %v4089_v19 = vpop.eup %4088  ;;  %v72_v48 = vmul.f32 %v71_v29, %v4209_v39 }
 0x3a8   :  { %v2699_v36 = vadd.f32 %v4061_v34, %v2698_v31  ;;  %v4091_v47 = vpop.eup %4090  ;;  %v2582_v34 = vld [vmem:[#allocation4] sm:$0xff] }
 0x3aa   :  { %v2700_v38 = vadd.f32 %v4063_v8, %v2699_v36  ;;  %v4093_v24 = vpop.eup %4092 }
 0x3ab   :  { %v4095_v31 = vpop.eup %4094 }
 0x3ac   :  { %v2701_v45 = vadd.f32 %v4065_v42, %v2700_v38  ;;  %v2583_v49 = vmul.f32 %v4095_v31, %v2582_v34 }
 0x3ae   :  { %v2702_v12 = vadd.f32 %v4067_v52, %v2701_v45 }
 0x3b0   :  { %v2703_v3 = vadd.f32 %v4069_v0, %v2702_v12 }
 0x3b2   :  { %v2704_v5 = vadd.f32 %v4071_v13, %v2703_v3 }
 0x3b4   :  { %v2705_v7 = vadd.f32 %v4073_v6, %v2704_v5 }
 0x3b6   :  { %v2706_v57 = vadd.f32 %v4075_v10, %v2705_v7 }
 0x3b8   :  { %v2707_v55 = vadd.f32 %v4077_v14, %v2706_v57 }
 0x3ba   :  { %v2708_v61 = vadd.f32 %v4079_v62, %v2707_v55 }
 0x3bc   :  { %v2709_v63 = vadd.f32 %v4081_v15, %v2708_v61 }
 0x3be   :  { %v2710_v26 = vadd.f32 %v4083_v16, %v2709_v63 }
 0x3c0   :  { %v2711_v33 = vadd.f32 %v4085_v43, %v2710_v26 }
 0x3c2   :  { %v2712_v27 = vadd.f32 %v4087_v18, %v2711_v33 }
 0x3c4   :  { %v2713_v44 = vadd.f32 %v4089_v19, %v2712_v27 }
 0x3c6   :  { %v2714_v1 = vadd.f32 %v4091_v47, %v2713_v44 }
 0x3c8   :  { %v2715_v30 = vadd.f32 %v4093_v24, %v2714_v1 }
 0x3ca   :  { %2716 = vadd.xlane.f32.xlu1 %v2715_v30 }
 0x3d2   :  { %73 = vadd.xlane.f32.xlu1 %v72_v48 }
 0x43d   :  { %v2717_v35 = vpop.xlane.xlu1 %2716 }
 0x43e   :  { %v2718_v36 = vadd.f32 %v2717_v35, %v2583_v49 }
 0x440   :  { %2720 = vst.msk [vmem:[#allocation4] sm:$0xff] %vm75_vm0, %v2718_v36 }
 0x445   :  { %v74_v8 = vpop.xlane.xlu1 %73 }
 0x446   :  { %76 = vst.msk [vmem:[#allocation5] sm:$0xff] %vm75_vm0, %v74_v8 }
 0x447   :  { %v2727_v20 = vld [vmem:[#allocation4] sm:$0xff] }
 0x448   :  { %3763 = vst.msk [vmem:[%s4442_s3 + $0x8] sm:$0xff] %vm75_vm0, %v2727_v20 }
 0x44d   :  { %v2730_v39 = vld [vmem:[#allocation5] sm:$0xff] }
 0x44e   :  { %3764 = vst.msk [vmem:[%s4442_s3 + $0x10] sm:$0xff] %vm75_vm0, %v2730_v39 }
 0x44f   :  { %2737 = vsyncpa [#allocation7], 1 }
 0x450   :  { %2738 = vsyncpa [#allocation9], 1 }

</bundles_post_ra>
